<compile_context>
chip_gen: v6e
topology: v6e:2x2x1
jax: 0.10.0
libtpu: 0.0.40
codegen_flags: <defaults>
</compile_context>

<pallas_src>
import functools
import math

import jax
import jax.numpy as jnp
from jax.experimental import pallas as pl
from jax.experimental.pallas import tpu as pltpu


# ----------------------------------------------------------------------------
# The single fused kernel
# ----------------------------------------------------------------------------

def _fused_clip_kernel(
    # ---- inputs (all full-array VMEM blocks) ----
    patches_ref,                 # (B*S, C*P*P)   row s==0 of each image is zeros (CLS slot)
    patch_w_ref,                 # (C*P*P, D)     conv1 as matmul (bias=False)
    base_ref,                    # (B*S, D)       pos_emb tiled over batch, cls folded into row 0
    pre_g_ref, pre_b_ref,        # (1, D)         ln_pre
    ln1_g_ref, ln1_b_ref,        # (L, 1, D)
    qkv_w_ref, qkv_b_ref,        # (L, D, 3D), (L, 1, 3D)   fused q|k|v
    o_w_ref, o_b_ref,            # (L, D, D), (L, 1, D)
    ln2_g_ref, ln2_b_ref,        # (L, 1, D)
    fc1_w_ref, fc1_b_ref,        # (L, D, M), (L, 1, M)
    fc2_w_ref, fc2_b_ref,        # (L, M, D), (L, 1, D)
    post_g_ref, post_b_ref,      # (1, D)         ln_post
    proj_w_ref,                  # (D, Pd)        visual_projection (no bias)
    cls_sel_ref,                 # (B, B*S)       one-hot rows selecting each image's CLS token
    prompts_ref,                 # (Pd, Ncls)     prompts_embedding
    scale_ref,                   # (1, 1)         logit_scale
    # ---- output ----
    logits_ref,                  # (B, Ncls)
    # ---- scratch ----
    attn_ref,                    # VMEM (B*S, D)  per-head attention outputs assembled here
    *, B, S, D, heads, layers,
):
    Dh = D // heads
    inv_sqrt_dh = 1.0 / math.sqrt(Dh)

    def layernorm(x, g, b):
        mu = jnp.mean(x, axis=-1, keepdims=True)
        var = jnp.mean(jnp.square(x - mu), axis=-1, keepdims=True)
        return (x - mu) * jax.lax.rsqrt(var + 1e-5) * g + b

    def matmul(x, w):
        return jax.lax.dot_general(
            x, w, (((1,), (0,)), ((), ())), preferred_element_type=jnp.float32)

    # ---- patch embedding + class/positional embedding (CLS rows are zero) ----
    h = matmul(patches_ref[...], patch_w_ref[...]) + base_ref[...]      # (B*S, D)

    # ---- ln_pre ----
    h = layernorm(h, pre_g_ref[...], pre_b_ref[...])

    # ---- transformer encoder layers (fully unrolled, all-resident in VMEM) ----
    for l in range(layers):
        # --- self-attention block: LN1 fused as prologue of the fused QKV matmul ---
        x = layernorm(h, ln1_g_ref[l], ln1_b_ref[l])
        qkv = matmul(x, qkv_w_ref[l]) + qkv_b_ref[l]                    # (B*S, 3D)

        for b in range(B):
            rows = slice(b * S, (b + 1) * S)
            for hd in range(heads):
                q = qkv[rows, hd * Dh:(hd + 1) * Dh]                    # (S, Dh)
                k = qkv[rows, D + hd * Dh:D + (hd + 1) * Dh]
                v = qkv[rows, 2 * D + hd * Dh:2 * D + (hd + 1) * Dh]
                s = jax.lax.dot_general(                                # q @ k^T
                    q, k, (((1,), (1,)), ((), ())),
                    preferred_element_type=jnp.float32) * inv_sqrt_dh
                s = s - jnp.max(s, axis=-1, keepdims=True)
                p = jnp.exp(s)
                p = p * pl.reciprocal(jnp.sum(p, axis=-1, keepdims=True),
                                      approx=True)
                attn_ref[rows, hd * Dh:(hd + 1) * Dh] = matmul(p, v)    # (S, Dh)

        h = h + matmul(attn_ref[...], o_w_ref[l]) + o_b_ref[l]

        # --- MLP block: LN2 fused as prologue, quick_gelu fused epilogue ---
        x = layernorm(h, ln2_g_ref[l], ln2_b_ref[l])
        y = matmul(x, fc1_w_ref[l]) + fc1_b_ref[l]
        y = y * jax.nn.sigmoid(1.702 * y)                               # quick_gelu
        h = h + matmul(y, fc2_w_ref[l]) + fc2_b_ref[l]

    # ---- pool CLS rows (one-hot matmul), ln_post, visual projection ----
    pooled = matmul(cls_sel_ref[...], h)                                # (B, D)
    pooled = layernorm(pooled, post_g_ref[...], post_b_ref[...])
    feats = matmul(pooled, proj_w_ref[...])                             # (B, Pd)

    # ---- L2 normalize + logits against the text-prompt classifier ----
    feats = feats * jax.lax.rsqrt(jnp.sum(feats * feats, axis=-1, keepdims=True))
    logits_ref[...] = scale_ref[...] * matmul(feats, prompts_ref[...])  # (B, Ncls)


# ----------------------------------------------------------------------------
# Forward wrapper (layout glue only; all math is inside the kernel)
# ----------------------------------------------------------------------------

@functools.partial(jax.jit, static_argnames=("patch", "heads"))
def myclip_forward(params, image, *, patch, heads):
    image = image.astype(jnp.float32)                 # image.type(self.dtype)
    B, C, H, W = image.shape
    D = params["patch_w"].shape[1]
    L = params["qkv_w"].shape[0]
    nh, nw = H // patch, W // patch
    S = nh * nw + 1
    cpp = C * patch * patch
    ncls = params["prompts"].shape[1]

    # Conv2d(k=stride=patch, bias=False) as im2col; prepend a zero row per image
    # for the CLS slot so the kernel fuses patch-embed + cls + pos-emb with no
    # in-kernel concatenation.
    patches = (image.reshape(B, C, nh, patch, nw, patch)
                    .transpose(0, 2, 4, 1, 3, 5)
                    .reshape(B, nh * nw, cpp))
    patches = jnp.pad(patches, ((0, 0), (1, 0), (0, 0))).reshape(B * S, cpp)

    base = jnp.tile(params["base_emb"], (B, 1))                        # (B*S, D)
    cls_sel = jax.nn.one_hot(jnp.arange(B) * S, B * S, dtype=jnp.float32)

    kernel = functools.partial(_fused_clip_kernel,
                               B=B, S=S, D=D, heads=heads, layers=L)
    return pl.pallas_call(
        kernel,
        out_shape=jax.ShapeDtypeStruct((B, ncls), jnp.float32),
        scratch_shapes=[pltpu.VMEM((B * S, D), jnp.float32)],
    )(patches, params["patch_w"], base,
      params["pre_ln_g"], params["pre_ln_b"],
      params["ln1_g"], params["ln1_b"],
      params["qkv_w"], params["qkv_b"],
      params["o_w"], params["o_b"],
      params["ln2_g"], params["ln2_b"],
      params["fc1_w"], params["fc1_b"],
      params["fc2_w"], params["fc2_b"],
      params["post_ln_g"], params["post_ln_b"],
      params["proj_w"], cls_sel, params["prompts"], params["logit_scale"])


# ----------------------------------------------------------------------------
# Deterministic synthetic parameters (pre-packed for the fused kernel)
# ----------------------------------------------------------------------------

def init_params(key, *, in_ch, patch, hidden, heads, mlp_dim, layers,
                proj_dim, num_patches, num_classes):
    D, M, L = hidden, mlp_dim, layers
    S = num_patches + 1

    def nrm(k, shape, std=0.02):
        return (std * jax.random.normal(k, shape)).astype(jnp.float32)

    ks = iter(jax.random.split(key, 12))
    cls = nrm(next(ks), (D,))
    pos = nrm(next(ks), (S, D))
    base_emb = pos.at[0].add(cls)                 # cls token folded into position 0 (once)
    prompts = nrm(next(ks), (proj_dim, num_classes), std=1.0)
    prompts = prompts / jnp.linalg.norm(prompts, axis=0, keepdims=True)

    return {
        "patch_w": nrm(next(ks), (in_ch * patch * patch, D)),
        "base_emb": base_emb,                                   # (S, D)
        "pre_ln_g": jnp.ones((1, D), jnp.float32),
        "pre_ln_b": jnp.zeros((1, D), jnp.float32),
        "ln1_g": jnp.ones((L, 1, D), jnp.float32),
        "ln1_b": jnp.zeros((L, 1, D), jnp.float32),
        "qkv_w": nrm(next(ks), (L, D, 3 * D)),                  # fused q|k|v
        "qkv_b": jnp.zeros((L, 1, 3 * D), jnp.float32),
        "o_w": nrm(next(ks), (L, D, D)),
        "o_b": jnp.zeros((L, 1, D), jnp.float32),
        "ln2_g": jnp.ones((L, 1, D), jnp.float32),
        "ln2_b": jnp.zeros((L, 1, D), jnp.float32),
        "fc1_w": nrm(next(ks), (L, D, M)),
        "fc1_b": jnp.zeros((L, 1, M), jnp.float32),
        "fc2_w": nrm(next(ks), (L, M, D)),
        "fc2_b": jnp.zeros((L, 1, D), jnp.float32),
        "post_ln_g": jnp.ones((1, D), jnp.float32),
        "post_ln_b": jnp.zeros((1, D), jnp.float32),
        "proj_w": nrm(next(ks), (D, proj_dim)),                 # visual_projection, no bias
        "prompts": prompts,                                     # (proj_dim, num_classes)
        "logit_scale": jnp.full((1, 1), math.log(1.0 / 0.07), jnp.float32),
    }


# ----------------------------------------------------------------------------

if __name__ == "__main__":
    key = jax.random.PRNGKey(0)
    k_img, k_par = jax.random.split(key)

    B, C, H, W = 2, 3, 16, 16
    PATCH, HID, HEADS, MLP, LAYERS, PROJ, NCLS = 8, 32, 2, 64, 2, 16, 128
    num_patches = (H // PATCH) * (W // PATCH)

    image = jax.random.normal(k_img, (B, C, H, W), dtype=jnp.float32)
    params = init_params(k_par, in_ch=C, patch=PATCH, hidden=HID, heads=HEADS,
                         mlp_dim=MLP, layers=LAYERS, proj_dim=PROJ,
                         num_patches=num_patches, num_classes=NCLS)

    logits = myclip_forward(params, image, patch=PATCH, heads=HEADS)
    jax.block_until_ready(logits)
    assert logits.shape == (B, NCLS) and logits.dtype == jnp.float32
    print("KERNEL_OK")
</pallas_src>

<mosaic_0001>
module attributes {stable_mosaic.version = 11 : i64} {
  func.func @_fused_clip_kernel(%arg0: memref<10x192xf32, #tpu.memory_space<vmem>>, %arg1: memref<192x32xf32, #tpu.memory_space<vmem>>, %arg2: memref<10x32xf32, #tpu.memory_space<vmem>>, %arg3: memref<1x32xf32, #tpu.memory_space<vmem>>, %arg4: memref<1x32xf32, #tpu.memory_space<vmem>>, %arg5: memref<2x1x32xf32, #tpu.memory_space<vmem>>, %arg6: memref<2x1x32xf32, #tpu.memory_space<vmem>>, %arg7: memref<2x32x96xf32, #tpu.memory_space<vmem>>, %arg8: memref<2x1x96xf32, #tpu.memory_space<vmem>>, %arg9: memref<2x32x32xf32, #tpu.memory_space<vmem>>, %arg10: memref<2x1x32xf32, #tpu.memory_space<vmem>>, %arg11: memref<2x1x32xf32, #tpu.memory_space<vmem>>, %arg12: memref<2x1x32xf32, #tpu.memory_space<vmem>>, %arg13: memref<2x32x64xf32, #tpu.memory_space<vmem>>, %arg14: memref<2x1x64xf32, #tpu.memory_space<vmem>>, %arg15: memref<2x64x32xf32, #tpu.memory_space<vmem>>, %arg16: memref<2x1x32xf32, #tpu.memory_space<vmem>>, %arg17: memref<1x32xf32, #tpu.memory_space<vmem>>, %arg18: memref<1x32xf32, #tpu.memory_space<vmem>>, %arg19: memref<32x16xf32, #tpu.memory_space<vmem>>, %arg20: memref<2x10xf32, #tpu.memory_space<vmem>>, %arg21: memref<16x128xf32, #tpu.memory_space<vmem>>, %arg22: memref<1x1xf32, #tpu.memory_space<vmem>>, %arg23: memref<2x128xf32, #tpu.memory_space<vmem>>, %arg24: memref<10x32xf32, #tpu.memory_space<vmem>>) attributes {dimension_semantics = [], scalar_prefetch = 0 : i64, scratch_operands = 1 : i64, tpu.core_type = #tpu.core_type<tc>} {
    %c0 = arith.constant 0 : index
    %c0_0 = arith.constant 0 : index
    %0 = vector.load %arg0[%c0, %c0_0] : memref<10x192xf32, #tpu.memory_space<vmem>>, vector<10x192xf32>
    %c0_1 = arith.constant 0 : index
    %c0_2 = arith.constant 0 : index
    %1 = vector.load %arg1[%c0_1, %c0_2] : memref<192x32xf32, #tpu.memory_space<vmem>>, vector<192x32xf32>
    %cst = arith.constant dense<0.000000e+00> : vector<10x32xf32>
    %2 = tpu.matmul %0, %1, %cst {dimension_numbers = #tpu.dot_dimension_numbers<[1], [0], [0], [1], [0, 0, 1, 1], [], []>} : vector<10x192xf32>, vector<192x32xf32>, vector<10x32xf32> -> vector<10x32xf32>
    %c0_3 = arith.constant 0 : index
    %c0_4 = arith.constant 0 : index
    %3 = vector.load %arg2[%c0_3, %c0_4] : memref<10x32xf32, #tpu.memory_space<vmem>>, vector<10x32xf32>
    %4 = arith.addf %2, %3 : vector<10x32xf32>
    %c0_5 = arith.constant 0 : index
    %c0_6 = arith.constant 0 : index
    %5 = vector.load %arg3[%c0_5, %c0_6] : memref<1x32xf32, #tpu.memory_space<vmem>>, vector<1x32xf32>
    %c0_7 = arith.constant 0 : index
    %c0_8 = arith.constant 0 : index
    %6 = vector.load %arg4[%c0_7, %c0_8] : memref<1x32xf32, #tpu.memory_space<vmem>>, vector<1x32xf32>
    %cst_9 = arith.constant dense<0.000000e+00> : vector<10xf32>
    %7 = vector.multi_reduction <add>, %4, %cst_9 [1] : vector<10x32xf32> to vector<10xf32>
    %8 = vector.shape_cast %7 : vector<10xf32> to vector<10x1xf32>
    %cst_10 = arith.constant 3.200000e+01 : f32
    %9 = vector.broadcast %cst_10 : f32 to vector<10x1xf32>
    %10 = arith.divf %8, %9 : vector<10x1xf32>
    %11 = vector.broadcast %10 : vector<10x1xf32> to vector<10x32xf32>
    %12 = arith.subf %4, %11 : vector<10x32xf32>
    %13 = arith.mulf %12, %12 : vector<10x32xf32>
    %cst_11 = arith.constant dense<0.000000e+00> : vector<10xf32>
    %14 = vector.multi_reduction <add>, %13, %cst_11 [1] : vector<10x32xf32> to vector<10xf32>
    %15 = vector.shape_cast %14 : vector<10xf32> to vector<10x1xf32>
    %cst_12 = arith.constant 3.200000e+01 : f32
    %16 = vector.broadcast %cst_12 : f32 to vector<10x1xf32>
    %17 = arith.divf %15, %16 : vector<10x1xf32>
    %18 = vector.broadcast %10 : vector<10x1xf32> to vector<10x32xf32>
    %19 = arith.subf %4, %18 : vector<10x32xf32>
    %cst_13 = arith.constant 9.99999974E-6 : f32
    %20 = vector.broadcast %cst_13 : f32 to vector<10x1xf32>
    %21 = arith.addf %17, %20 : vector<10x1xf32>
    %22 = math.rsqrt %21 : vector<10x1xf32>
    %23 = vector.broadcast %22 : vector<10x1xf32> to vector<10x32xf32>
    %24 = arith.mulf %19, %23 : vector<10x32xf32>
    %25 = vector.broadcast %5 : vector<1x32xf32> to vector<10x32xf32>
    %26 = arith.mulf %24, %25 : vector<10x32xf32>
    %27 = vector.broadcast %6 : vector<1x32xf32> to vector<10x32xf32>
    %28 = arith.addf %26, %27 : vector<10x32xf32>
    %c0_14 = arith.constant 0 : index
    %c0_15 = arith.constant 0 : index
    %c0_16 = arith.constant 0 : index
    %29 = vector.load %arg5[%c0_14, %c0_15, %c0_16] : memref<2x1x32xf32, #tpu.memory_space<vmem>>, vector<1x1x32xf32>
    %30 = vector.shape_cast %29 : vector<1x1x32xf32> to vector<1x32xf32>
    %c0_17 = arith.constant 0 : index
    %c0_18 = arith.constant 0 : index
    %c0_19 = arith.constant 0 : index
    %31 = vector.load %arg6[%c0_17, %c0_18, %c0_19] : memref<2x1x32xf32, #tpu.memory_space<vmem>>, vector<1x1x32xf32>
    %32 = vector.shape_cast %31 : vector<1x1x32xf32> to vector<1x32xf32>
    %cst_20 = arith.constant dense<0.000000e+00> : vector<10xf32>
    %33 = vector.multi_reduction <add>, %28, %cst_20 [1] : vector<10x32xf32> to vector<10xf32>
    %34 = vector.shape_cast %33 : vector<10xf32> to vector<10x1xf32>
    %cst_21 = arith.constant 3.200000e+01 : f32
    %35 = vector.broadcast %cst_21 : f32 to vector<10x1xf32>
    %36 = arith.divf %34, %35 : vector<10x1xf32>
    %37 = vector.broadcast %36 : vector<10x1xf32> to vector<10x32xf32>
    %38 = arith.subf %28, %37 : vector<10x32xf32>
    %39 = arith.mulf %38, %38 : vector<10x32xf32>
    %cst_22 = arith.constant dense<0.000000e+00> : vector<10xf32>
    %40 = vector.multi_reduction <add>, %39, %cst_22 [1] : vector<10x32xf32> to vector<10xf32>
    %41 = vector.shape_cast %40 : vector<10xf32> to vector<10x1xf32>
    %cst_23 = arith.constant 3.200000e+01 : f32
    %42 = vector.broadcast %cst_23 : f32 to vector<10x1xf32>
    %43 = arith.divf %41, %42 : vector<10x1xf32>
    %44 = vector.broadcast %36 : vector<10x1xf32> to vector<10x32xf32>
    %45 = arith.subf %28, %44 : vector<10x32xf32>
    %cst_24 = arith.constant 9.99999974E-6 : f32
    %46 = vector.broadcast %cst_24 : f32 to vector<10x1xf32>
    %47 = arith.addf %43, %46 : vector<10x1xf32>
    %48 = math.rsqrt %47 : vector<10x1xf32>
    %49 = vector.broadcast %48 : vector<10x1xf32> to vector<10x32xf32>
    %50 = arith.mulf %45, %49 : vector<10x32xf32>
    %51 = vector.broadcast %30 : vector<1x32xf32> to vector<10x32xf32>
    %52 = arith.mulf %50, %51 : vector<10x32xf32>
    %53 = vector.broadcast %32 : vector<1x32xf32> to vector<10x32xf32>
    %54 = arith.addf %52, %53 : vector<10x32xf32>
    %c0_25 = arith.constant 0 : index
    %c0_26 = arith.constant 0 : index
    %c0_27 = arith.constant 0 : index
    %55 = vector.load %arg7[%c0_25, %c0_26, %c0_27] : memref<2x32x96xf32, #tpu.memory_space<vmem>>, vector<1x32x96xf32>
    %56 = vector.shape_cast %55 : vector<1x32x96xf32> to vector<32x96xf32>
    %cst_28 = arith.constant dense<0.000000e+00> : vector<10x96xf32>
    %57 = tpu.matmul %54, %56, %cst_28 {dimension_numbers = #tpu.dot_dimension_numbers<[1], [0], [0], [1], [0, 0, 1, 1], [], []>} : vector<10x32xf32>, vector<32x96xf32>, vector<10x96xf32> -> vector<10x96xf32>
    %c0_29 = arith.constant 0 : index
    %c0_30 = arith.constant 0 : index
    %c0_31 = arith.constant 0 : index
    %58 = vector.load %arg8[%c0_29, %c0_30, %c0_31] : memref<2x1x96xf32, #tpu.memory_space<vmem>>, vector<1x1x96xf32>
    %59 = vector.shape_cast %58 : vector<1x1x96xf32> to vector<1x96xf32>
    %60 = vector.broadcast %59 : vector<1x96xf32> to vector<10x96xf32>
    %61 = arith.addf %57, %60 : vector<10x96xf32>
    %62 = vector.extract_strided_slice %61 {offsets = [0, 0], sizes = [5, 16], strides = [1, 1]} : vector<10x96xf32> to vector<5x16xf32>
    %63 = vector.extract_strided_slice %61 {offsets = [0, 32], sizes = [5, 16], strides = [1, 1]} : vector<10x96xf32> to vector<5x16xf32>
    %64 = vector.extract_strided_slice %61 {offsets = [0, 64], sizes = [5, 16], strides = [1, 1]} : vector<10x96xf32> to vector<5x16xf32>
    %cst_32 = arith.constant dense<0.000000e+00> : vector<5x5xf32>
    %65 = tpu.matmul %62, %63, %cst_32 {dimension_numbers = #tpu.dot_dimension_numbers<[1], [1], [0], [0], [0, 0, 1, 0], [], []>} : vector<5x16xf32>, vector<5x16xf32>, vector<5x5xf32> -> vector<5x5xf32>
    %cst_33 = arith.constant 2.500000e-01 : f32
    %66 = vector.broadcast %cst_33 : f32 to vector<5x5xf32>
    %67 = arith.mulf %65, %66 : vector<5x5xf32>
    %cst_34 = arith.constant dense<0xFF800000> : vector<5xf32>
    %68 = vector.multi_reduction <maximumf>, %67, %cst_34 [1] : vector<5x5xf32> to vector<5xf32>
    %69 = vector.shape_cast %68 : vector<5xf32> to vector<5x1xf32>
    %70 = vector.broadcast %69 : vector<5x1xf32> to vector<5x5xf32>
    %71 = arith.subf %67, %70 : vector<5x5xf32>
    %72 = math.exp %71 : vector<5x5xf32>
    %cst_35 = arith.constant dense<0.000000e+00> : vector<5xf32>
    %73 = vector.multi_reduction <add>, %72, %cst_35 [1] : vector<5x5xf32> to vector<5xf32>
    %74 = vector.shape_cast %73 : vector<5xf32> to vector<5x1xf32>
    %75 = tpu.reciprocal %74 {approx = true} : vector<5x1xf32> -> vector<5x1xf32>
    %76 = vector.broadcast %75 : vector<5x1xf32> to vector<5x5xf32>
    %77 = arith.mulf %72, %76 : vector<5x5xf32>
    %cst_36 = arith.constant dense<0.000000e+00> : vector<5x16xf32>
    %78 = tpu.matmul %77, %64, %cst_36 {dimension_numbers = #tpu.dot_dimension_numbers<[1], [0], [0], [1], [0, 0, 1, 1], [], []>} : vector<5x5xf32>, vector<5x16xf32>, vector<5x16xf32> -> vector<5x16xf32>
    %c0_37 = arith.constant 0 : index
    %c0_38 = arith.constant 0 : index
    %79 = vector.load %arg24[%c0_37, %c0_38] : memref<10x32xf32, #tpu.memory_space<vmem>>, vector<5x16xf32>
    tpu.vector_store %arg24[%c0_37, %c0_38], %78 {strides = array<i32>} : memref<10x32xf32, #tpu.memory_space<vmem>>, vector<5x16xf32>,
    %80 = vector.extract_strided_slice %61 {offsets = [0, 16], sizes = [5, 16], strides = [1, 1]} : vector<10x96xf32> to vector<5x16xf32>
    %81 = vector.extract_strided_slice %61 {offsets = [0, 48], sizes = [5, 16], strides = [1, 1]} : vector<10x96xf32> to vector<5x16xf32>
    %82 = vector.extract_strided_slice %61 {offsets = [0, 80], sizes = [5, 16], strides = [1, 1]} : vector<10x96xf32> to vector<5x16xf32>
    %cst_39 = arith.constant dense<0.000000e+00> : vector<5x5xf32>
    %83 = tpu.matmul %80, %81, %cst_39 {dimension_numbers = #tpu.dot_dimension_numbers<[1], [1], [0], [0], [0, 0, 1, 0], [], []>} : vector<5x16xf32>, vector<5x16xf32>, vector<5x5xf32> -> vector<5x5xf32>
    %cst_40 = arith.constant 2.500000e-01 : f32
    %84 = vector.broadcast %cst_40 : f32 to vector<5x5xf32>
    %85 = arith.mulf %83, %84 : vector<5x5xf32>
    %cst_41 = arith.constant dense<0xFF800000> : vector<5xf32>
    %86 = vector.multi_reduction <maximumf>, %85, %cst_41 [1] : vector<5x5xf32> to vector<5xf32>
    %87 = vector.shape_cast %86 : vector<5xf32> to vector<5x1xf32>
    %88 = vector.broadcast %87 : vector<5x1xf32> to vector<5x5xf32>
    %89 = arith.subf %85, %88 : vector<5x5xf32>
    %90 = math.exp %89 : vector<5x5xf32>
    %cst_42 = arith.constant dense<0.000000e+00> : vector<5xf32>
    %91 = vector.multi_reduction <add>, %90, %cst_42 [1] : vector<5x5xf32> to vector<5xf32>
    %92 = vector.shape_cast %91 : vector<5xf32> to vector<5x1xf32>
    %93 = tpu.reciprocal %92 {approx = true} : vector<5x1xf32> -> vector<5x1xf32>
    %94 = vector.broadcast %93 : vector<5x1xf32> to vector<5x5xf32>
    %95 = arith.mulf %90, %94 : vector<5x5xf32>
    %cst_43 = arith.constant dense<0.000000e+00> : vector<5x16xf32>
    %96 = tpu.matmul %95, %82, %cst_43 {dimension_numbers = #tpu.dot_dimension_numbers<[1], [0], [0], [1], [0, 0, 1, 1], [], []>} : vector<5x5xf32>, vector<5x16xf32>, vector<5x16xf32> -> vector<5x16xf32>
    %c0_44 = arith.constant 0 : index
    %c16 = arith.constant 16 : index
    %97 = vector.load %arg24[%c0_44, %c16] : memref<10x32xf32, #tpu.memory_space<vmem>>, vector<5x16xf32>
    tpu.vector_store %arg24[%c0_44, %c16], %96 {strides = array<i32>} : memref<10x32xf32, #tpu.memory_space<vmem>>, vector<5x16xf32>,
    %98 = vector.extract_strided_slice %61 {offsets = [5, 0], sizes = [5, 16], strides = [1, 1]} : vector<10x96xf32> to vector<5x16xf32>
    %99 = vector.extract_strided_slice %61 {offsets = [5, 32], sizes = [5, 16], strides = [1, 1]} : vector<10x96xf32> to vector<5x16xf32>
    %100 = vector.extract_strided_slice %61 {offsets = [5, 64], sizes = [5, 16], strides = [1, 1]} : vector<10x96xf32> to vector<5x16xf32>
    %cst_45 = arith.constant dense<0.000000e+00> : vector<5x5xf32>
    %101 = tpu.matmul %98, %99, %cst_45 {dimension_numbers = #tpu.dot_dimension_numbers<[1], [1], [0], [0], [0, 0, 1, 0], [], []>} : vector<5x16xf32>, vector<5x16xf32>, vector<5x5xf32> -> vector<5x5xf32>
    %cst_46 = arith.constant 2.500000e-01 : f32
    %102 = vector.broadcast %cst_46 : f32 to vector<5x5xf32>
    %103 = arith.mulf %101, %102 : vector<5x5xf32>
    %cst_47 = arith.constant dense<0xFF800000> : vector<5xf32>
    %104 = vector.multi_reduction <maximumf>, %103, %cst_47 [1] : vector<5x5xf32> to vector<5xf32>
    %105 = vector.shape_cast %104 : vector<5xf32> to vector<5x1xf32>
    %106 = vector.broadcast %105 : vector<5x1xf32> to vector<5x5xf32>
    %107 = arith.subf %103, %106 : vector<5x5xf32>
    %108 = math.exp %107 : vector<5x5xf32>
    %cst_48 = arith.constant dense<0.000000e+00> : vector<5xf32>
    %109 = vector.multi_reduction <add>, %108, %cst_48 [1] : vector<5x5xf32> to vector<5xf32>
    %110 = vector.shape_cast %109 : vector<5xf32> to vector<5x1xf32>
    %111 = tpu.reciprocal %110 {approx = true} : vector<5x1xf32> -> vector<5x1xf32>
    %112 = vector.broadcast %111 : vector<5x1xf32> to vector<5x5xf32>
    %113 = arith.mulf %108, %112 : vector<5x5xf32>
    %cst_49 = arith.constant dense<0.000000e+00> : vector<5x16xf32>
    %114 = tpu.matmul %113, %100, %cst_49 {dimension_numbers = #tpu.dot_dimension_numbers<[1], [0], [0], [1], [0, 0, 1, 1], [], []>} : vector<5x5xf32>, vector<5x16xf32>, vector<5x16xf32> -> vector<5x16xf32>
    %c5 = arith.constant 5 : index
    %c0_50 = arith.constant 0 : index
    %115 = vector.load %arg24[%c5, %c0_50] : memref<10x32xf32, #tpu.memory_space<vmem>>, vector<5x16xf32>
    tpu.vector_store %arg24[%c5, %c0_50], %114 {strides = array<i32>} : memref<10x32xf32, #tpu.memory_space<vmem>>, vector<5x16xf32>,
    %116 = vector.extract_strided_slice %61 {offsets = [5, 16], sizes = [5, 16], strides = [1, 1]} : vector<10x96xf32> to vector<5x16xf32>
    %117 = vector.extract_strided_slice %61 {offsets = [5, 48], sizes = [5, 16], strides = [1, 1]} : vector<10x96xf32> to vector<5x16xf32>
    %118 = vector.extract_strided_slice %61 {offsets = [5, 80], sizes = [5, 16], strides = [1, 1]} : vector<10x96xf32> to vector<5x16xf32>
    %cst_51 = arith.constant dense<0.000000e+00> : vector<5x5xf32>
    %119 = tpu.matmul %116, %117, %cst_51 {dimension_numbers = #tpu.dot_dimension_numbers<[1], [1], [0], [0], [0, 0, 1, 0], [], []>} : vector<5x16xf32>, vector<5x16xf32>, vector<5x5xf32> -> vector<5x5xf32>
    %cst_52 = arith.constant 2.500000e-01 : f32
    %120 = vector.broadcast %cst_52 : f32 to vector<5x5xf32>
    %121 = arith.mulf %119, %120 : vector<5x5xf32>
    %cst_53 = arith.constant dense<0xFF800000> : vector<5xf32>
    %122 = vector.multi_reduction <maximumf>, %121, %cst_53 [1] : vector<5x5xf32> to vector<5xf32>
    %123 = vector.shape_cast %122 : vector<5xf32> to vector<5x1xf32>
    %124 = vector.broadcast %123 : vector<5x1xf32> to vector<5x5xf32>
    %125 = arith.subf %121, %124 : vector<5x5xf32>
    %126 = math.exp %125 : vector<5x5xf32>
    %cst_54 = arith.constant dense<0.000000e+00> : vector<5xf32>
    %127 = vector.multi_reduction <add>, %126, %cst_54 [1] : vector<5x5xf32> to vector<5xf32>
    %128 = vector.shape_cast %127 : vector<5xf32> to vector<5x1xf32>
    %129 = tpu.reciprocal %128 {approx = true} : vector<5x1xf32> -> vector<5x1xf32>
    %130 = vector.broadcast %129 : vector<5x1xf32> to vector<5x5xf32>
    %131 = arith.mulf %126, %130 : vector<5x5xf32>
    %cst_55 = arith.constant dense<0.000000e+00> : vector<5x16xf32>
    %132 = tpu.matmul %131, %118, %cst_55 {dimension_numbers = #tpu.dot_dimension_numbers<[1], [0], [0], [1], [0, 0, 1, 1], [], []>} : vector<5x5xf32>, vector<5x16xf32>, vector<5x16xf32> -> vector<5x16xf32>
    %c5_56 = arith.constant 5 : index
    %c16_57 = arith.constant 16 : index
    %133 = vector.load %arg24[%c5_56, %c16_57] : memref<10x32xf32, #tpu.memory_space<vmem>>, vector<5x16xf32>
    tpu.vector_store %arg24[%c5_56, %c16_57], %132 {strides = array<i32>} : memref<10x32xf32, #tpu.memory_space<vmem>>, vector<5x16xf32>,
    %c0_58 = arith.constant 0 : index
    %c0_59 = arith.constant 0 : index
    %134 = vector.load %arg24[%c0_58, %c0_59] : memref<10x32xf32, #tpu.memory_space<vmem>>, vector<10x32xf32>
    %c0_60 = arith.constant 0 : index
    %c0_61 = arith.constant 0 : index
    %c0_62 = arith.constant 0 : index
    %135 = vector.load %arg9[%c0_60, %c0_61, %c0_62] : memref<2x32x32xf32, #tpu.memory_space<vmem>>, vector<1x32x32xf32>
    %136 = vector.shape_cast %135 : vector<1x32x32xf32> to vector<32x32xf32>
    %cst_63 = arith.constant dense<0.000000e+00> : vector<10x32xf32>
    %137 = tpu.matmul %134, %136, %cst_63 {dimension_numbers = #tpu.dot_dimension_numbers<[1], [0], [0], [1], [0, 0, 1, 1], [], []>} : vector<10x32xf32>, vector<32x32xf32>, vector<10x32xf32> -> vector<10x32xf32>
    %138 = arith.addf %28, %137 : vector<10x32xf32>
    %c0_64 = arith.constant 0 : index
    %c0_65 = arith.constant 0 : index
    %c0_66 = arith.constant 0 : index
    %139 = vector.load %arg10[%c0_64, %c0_65, %c0_66] : memref<2x1x32xf32, #tpu.memory_space<vmem>>, vector<1x1x32xf32>
    %140 = vector.shape_cast %139 : vector<1x1x32xf32> to vector<1x32xf32>
    %141 = vector.broadcast %140 : vector<1x32xf32> to vector<10x32xf32>
    %142 = arith.addf %138, %141 : vector<10x32xf32>
    %c0_67 = arith.constant 0 : index
    %c0_68 = arith.constant 0 : index
    %c0_69 = arith.constant 0 : index
    %143 = vector.load %arg11[%c0_67, %c0_68, %c0_69] : memref<2x1x32xf32, #tpu.memory_space<vmem>>, vector<1x1x32xf32>
    %144 = vector.shape_cast %143 : vector<1x1x32xf32> to vector<1x32xf32>
    %c0_70 = arith.constant 0 : index
    %c0_71 = arith.constant 0 : index
    %c0_72 = arith.constant 0 : index
    %145 = vector.load %arg12[%c0_70, %c0_71, %c0_72] : memref<2x1x32xf32, #tpu.memory_space<vmem>>, vector<1x1x32xf32>
    %146 = vector.shape_cast %145 : vector<1x1x32xf32> to vector<1x32xf32>
    %cst_73 = arith.constant dense<0.000000e+00> : vector<10xf32>
    %147 = vector.multi_reduction <add>, %142, %cst_73 [1] : vector<10x32xf32> to vector<10xf32>
    %148 = vector.shape_cast %147 : vector<10xf32> to vector<10x1xf32>
    %cst_74 = arith.constant 3.200000e+01 : f32
    %149 = vector.broadcast %cst_74 : f32 to vector<10x1xf32>
    %150 = arith.divf %148, %149 : vector<10x1xf32>
    %151 = vector.broadcast %150 : vector<10x1xf32> to vector<10x32xf32>
    %152 = arith.subf %142, %151 : vector<10x32xf32>
    %153 = arith.mulf %152, %152 : vector<10x32xf32>
    %cst_75 = arith.constant dense<0.000000e+00> : vector<10xf32>
    %154 = vector.multi_reduction <add>, %153, %cst_75 [1] : vector<10x32xf32> to vector<10xf32>
    %155 = vector.shape_cast %154 : vector<10xf32> to vector<10x1xf32>
    %cst_76 = arith.constant 3.200000e+01 : f32
    %156 = vector.broadcast %cst_76 : f32 to vector<10x1xf32>
    %157 = arith.divf %155, %156 : vector<10x1xf32>
    %158 = vector.broadcast %150 : vector<10x1xf32> to vector<10x32xf32>
    %159 = arith.subf %142, %158 : vector<10x32xf32>
    %cst_77 = arith.constant 9.99999974E-6 : f32
    %160 = vector.broadcast %cst_77 : f32 to vector<10x1xf32>
    %161 = arith.addf %157, %160 : vector<10x1xf32>
    %162 = math.rsqrt %161 : vector<10x1xf32>
    %163 = vector.broadcast %162 : vector<10x1xf32> to vector<10x32xf32>
    %164 = arith.mulf %159, %163 : vector<10x32xf32>
    %165 = vector.broadcast %144 : vector<1x32xf32> to vector<10x32xf32>
    %166 = arith.mulf %164, %165 : vector<10x32xf32>
    %167 = vector.broadcast %146 : vector<1x32xf32> to vector<10x32xf32>
    %168 = arith.addf %166, %167 : vector<10x32xf32>
    %c0_78 = arith.constant 0 : index
    %c0_79 = arith.constant 0 : index
    %c0_80 = arith.constant 0 : index
    %169 = vector.load %arg13[%c0_78, %c0_79, %c0_80] : memref<2x32x64xf32, #tpu.memory_space<vmem>>, vector<1x32x64xf32>
    %170 = vector.shape_cast %169 : vector<1x32x64xf32> to vector<32x64xf32>
    %cst_81 = arith.constant dense<0.000000e+00> : vector<10x64xf32>
    %171 = tpu.matmul %168, %170, %cst_81 {dimension_numbers = #tpu.dot_dimension_numbers<[1], [0], [0], [1], [0, 0, 1, 1], [], []>} : vector<10x32xf32>, vector<32x64xf32>, vector<10x64xf32> -> vector<10x64xf32>
    %c0_82 = arith.constant 0 : index
    %c0_83 = arith.constant 0 : index
    %c0_84 = arith.constant 0 : index
    %172 = vector.load %arg14[%c0_82, %c0_83, %c0_84] : memref<2x1x64xf32, #tpu.memory_space<vmem>>, vector<1x1x64xf32>
    %173 = vector.shape_cast %172 : vector<1x1x64xf32> to vector<1x64xf32>
    %174 = vector.broadcast %173 : vector<1x64xf32> to vector<10x64xf32>
    %175 = arith.addf %171, %174 : vector<10x64xf32>
    %cst_85 = arith.constant 1.702000e+00 : f32
    %176 = vector.broadcast %cst_85 : f32 to vector<10x64xf32>
    %177 = arith.mulf %176, %175 : vector<10x64xf32>
    %178 = arith.negf %177 : vector<10x64xf32>
    %179 = math.exp %178 : vector<10x64xf32>
    %cst_86 = arith.constant 1.000000e+00 : f32
    %180 = vector.broadcast %cst_86 : f32 to vector<10x64xf32>
    %181 = arith.addf %180, %179 : vector<10x64xf32>
    %182 = arith.divf %180, %181 : vector<10x64xf32>
    %183 = arith.mulf %175, %182 : vector<10x64xf32>
    %c0_87 = arith.constant 0 : index
    %c0_88 = arith.constant 0 : index
    %c0_89 = arith.constant 0 : index
    %184 = vector.load %arg15[%c0_87, %c0_88, %c0_89] : memref<2x64x32xf32, #tpu.memory_space<vmem>>, vector<1x64x32xf32>
    %185 = vector.shape_cast %184 : vector<1x64x32xf32> to vector<64x32xf32>
    %cst_90 = arith.constant dense<0.000000e+00> : vector<10x32xf32>
    %186 = tpu.matmul %183, %185, %cst_90 {dimension_numbers = #tpu.dot_dimension_numbers<[1], [0], [0], [1], [0, 0, 1, 1], [], []>} : vector<10x64xf32>, vector<64x32xf32>, vector<10x32xf32> -> vector<10x32xf32>
    %187 = arith.addf %142, %186 : vector<10x32xf32>
    %c0_91 = arith.constant 0 : index
    %c0_92 = arith.constant 0 : index
    %c0_93 = arith.constant 0 : index
    %188 = vector.load %arg16[%c0_91, %c0_92, %c0_93] : memref<2x1x32xf32, #tpu.memory_space<vmem>>, vector<1x1x32xf32>
    %189 = vector.shape_cast %188 : vector<1x1x32xf32> to vector<1x32xf32>
    %190 = vector.broadcast %189 : vector<1x32xf32> to vector<10x32xf32>
    %191 = arith.addf %187, %190 : vector<10x32xf32>
    %c1 = arith.constant 1 : index
    %c0_94 = arith.constant 0 : index
    %c0_95 = arith.constant 0 : index
    %192 = vector.load %arg5[%c1, %c0_94, %c0_95] : memref<2x1x32xf32, #tpu.memory_space<vmem>>, vector<1x1x32xf32>
    %193 = vector.shape_cast %192 : vector<1x1x32xf32> to vector<1x32xf32>
    %c1_96 = arith.constant 1 : index
    %c0_97 = arith.constant 0 : index
    %c0_98 = arith.constant 0 : index
    %194 = vector.load %arg6[%c1_96, %c0_97, %c0_98] : memref<2x1x32xf32, #tpu.memory_space<vmem>>, vector<1x1x32xf32>
    %195 = vector.shape_cast %194 : vector<1x1x32xf32> to vector<1x32xf32>
    %cst_99 = arith.constant dense<0.000000e+00> : vector<10xf32>
    %196 = vector.multi_reduction <add>, %191, %cst_99 [1] : vector<10x32xf32> to vector<10xf32>
    %197 = vector.shape_cast %196 : vector<10xf32> to vector<10x1xf32>
    %cst_100 = arith.constant 3.200000e+01 : f32
    %198 = vector.broadcast %cst_100 : f32 to vector<10x1xf32>
    %199 = arith.divf %197, %198 : vector<10x1xf32>
    %200 = vector.broadcast %199 : vector<10x1xf32> to vector<10x32xf32>
    %201 = arith.subf %191, %200 : vector<10x32xf32>
    %202 = arith.mulf %201, %201 : vector<10x32xf32>
    %cst_101 = arith.constant dense<0.000000e+00> : vector<10xf32>
    %203 = vector.multi_reduction <add>, %202, %cst_101 [1] : vector<10x32xf32> to vector<10xf32>
    %204 = vector.shape_cast %203 : vector<10xf32> to vector<10x1xf32>
    %cst_102 = arith.constant 3.200000e+01 : f32
    %205 = vector.broadcast %cst_102 : f32 to vector<10x1xf32>
    %206 = arith.divf %204, %205 : vector<10x1xf32>
    %207 = vector.broadcast %199 : vector<10x1xf32> to vector<10x32xf32>
    %208 = arith.subf %191, %207 : vector<10x32xf32>
    %cst_103 = arith.constant 9.99999974E-6 : f32
    %209 = vector.broadcast %cst_103 : f32 to vector<10x1xf32>
    %210 = arith.addf %206, %209 : vector<10x1xf32>
    %211 = math.rsqrt %210 : vector<10x1xf32>
    %212 = vector.broadcast %211 : vector<10x1xf32> to vector<10x32xf32>
    %213 = arith.mulf %208, %212 : vector<10x32xf32>
    %214 = vector.broadcast %193 : vector<1x32xf32> to vector<10x32xf32>
    %215 = arith.mulf %213, %214 : vector<10x32xf32>
    %216 = vector.broadcast %195 : vector<1x32xf32> to vector<10x32xf32>
    %217 = arith.addf %215, %216 : vector<10x32xf32>
    %c1_104 = arith.constant 1 : index
    %c0_105 = arith.constant 0 : index
    %c0_106 = arith.constant 0 : index
    %218 = vector.load %arg7[%c1_104, %c0_105, %c0_106] : memref<2x32x96xf32, #tpu.memory_space<vmem>>, vector<1x32x96xf32>
    %219 = vector.shape_cast %218 : vector<1x32x96xf32> to vector<32x96xf32>
    %cst_107 = arith.constant dense<0.000000e+00> : vector<10x96xf32>
    %220 = tpu.matmul %217, %219, %cst_107 {dimension_numbers = #tpu.dot_dimension_numbers<[1], [0], [0], [1], [0, 0, 1, 1], [], []>} : vector<10x32xf32>, vector<32x96xf32>, vector<10x96xf32> -> vector<10x96xf32>
    %c1_108 = arith.constant 1 : index
    %c0_109 = arith.constant 0 : index
    %c0_110 = arith.constant 0 : index
    %221 = vector.load %arg8[%c1_108, %c0_109, %c0_110] : memref<2x1x96xf32, #tpu.memory_space<vmem>>, vector<1x1x96xf32>
    %222 = vector.shape_cast %221 : vector<1x1x96xf32> to vector<1x96xf32>
    %223 = vector.broadcast %222 : vector<1x96xf32> to vector<10x96xf32>
    %224 = arith.addf %220, %223 : vector<10x96xf32>
    %225 = vector.extract_strided_slice %224 {offsets = [0, 0], sizes = [5, 16], strides = [1, 1]} : vector<10x96xf32> to vector<5x16xf32>
    %226 = vector.extract_strided_slice %224 {offsets = [0, 32], sizes = [5, 16], strides = [1, 1]} : vector<10x96xf32> to vector<5x16xf32>
    %227 = vector.extract_strided_slice %224 {offsets = [0, 64], sizes = [5, 16], strides = [1, 1]} : vector<10x96xf32> to vector<5x16xf32>
    %cst_111 = arith.constant dense<0.000000e+00> : vector<5x5xf32>
    %228 = tpu.matmul %225, %226, %cst_111 {dimension_numbers = #tpu.dot_dimension_numbers<[1], [1], [0], [0], [0, 0, 1, 0], [], []>} : vector<5x16xf32>, vector<5x16xf32>, vector<5x5xf32> -> vector<5x5xf32>
    %cst_112 = arith.constant 2.500000e-01 : f32
    %229 = vector.broadcast %cst_112 : f32 to vector<5x5xf32>
    %230 = arith.mulf %228, %229 : vector<5x5xf32>
    %cst_113 = arith.constant dense<0xFF800000> : vector<5xf32>
    %231 = vector.multi_reduction <maximumf>, %230, %cst_113 [1] : vector<5x5xf32> to vector<5xf32>
    %232 = vector.shape_cast %231 : vector<5xf32> to vector<5x1xf32>
    %233 = vector.broadcast %232 : vector<5x1xf32> to vector<5x5xf32>
    %234 = arith.subf %230, %233 : vector<5x5xf32>
    %235 = math.exp %234 : vector<5x5xf32>
    %cst_114 = arith.constant dense<0.000000e+00> : vector<5xf32>
    %236 = vector.multi_reduction <add>, %235, %cst_114 [1] : vector<5x5xf32> to vector<5xf32>
    %237 = vector.shape_cast %236 : vector<5xf32> to vector<5x1xf32>
    %238 = tpu.reciprocal %237 {approx = true} : vector<5x1xf32> -> vector<5x1xf32>
    %239 = vector.broadcast %238 : vector<5x1xf32> to vector<5x5xf32>
    %240 = arith.mulf %235, %239 : vector<5x5xf32>
    %cst_115 = arith.constant dense<0.000000e+00> : vector<5x16xf32>
    %241 = tpu.matmul %240, %227, %cst_115 {dimension_numbers = #tpu.dot_dimension_numbers<[1], [0], [0], [1], [0, 0, 1, 1], [], []>} : vector<5x5xf32>, vector<5x16xf32>, vector<5x16xf32> -> vector<5x16xf32>
    %c0_116 = arith.constant 0 : index
    %c0_117 = arith.constant 0 : index
    %242 = vector.load %arg24[%c0_116, %c0_117] : memref<10x32xf32, #tpu.memory_space<vmem>>, vector<5x16xf32>
    tpu.vector_store %arg24[%c0_116, %c0_117], %241 {strides = array<i32>} : memref<10x32xf32, #tpu.memory_space<vmem>>, vector<5x16xf32>,
    %243 = vector.extract_strided_slice %224 {offsets = [0, 16], sizes = [5, 16], strides = [1, 1]} : vector<10x96xf32> to vector<5x16xf32>
    %244 = vector.extract_strided_slice %224 {offsets = [0, 48], sizes = [5, 16], strides = [1, 1]} : vector<10x96xf32> to vector<5x16xf32>
    %245 = vector.extract_strided_slice %224 {offsets = [0, 80], sizes = [5, 16], strides = [1, 1]} : vector<10x96xf32> to vector<5x16xf32>
    %cst_118 = arith.constant dense<0.000000e+00> : vector<5x5xf32>
    %246 = tpu.matmul %243, %244, %cst_118 {dimension_numbers = #tpu.dot_dimension_numbers<[1], [1], [0], [0], [0, 0, 1, 0], [], []>} : vector<5x16xf32>, vector<5x16xf32>, vector<5x5xf32> -> vector<5x5xf32>
    %cst_119 = arith.constant 2.500000e-01 : f32
    %247 = vector.broadcast %cst_119 : f32 to vector<5x5xf32>
    %248 = arith.mulf %246, %247 : vector<5x5xf32>
    %cst_120 = arith.constant dense<0xFF800000> : vector<5xf32>
    %249 = vector.multi_reduction <maximumf>, %248, %cst_120 [1] : vector<5x5xf32> to vector<5xf32>
    %250 = vector.shape_cast %249 : vector<5xf32> to vector<5x1xf32>
    %251 = vector.broadcast %250 : vector<5x1xf32> to vector<5x5xf32>
    %252 = arith.subf %248, %251 : vector<5x5xf32>
    %253 = math.exp %252 : vector<5x5xf32>
    %cst_121 = arith.constant dense<0.000000e+00> : vector<5xf32>
    %254 = vector.multi_reduction <add>, %253, %cst_121 [1] : vector<5x5xf32> to vector<5xf32>
    %255 = vector.shape_cast %254 : vector<5xf32> to vector<5x1xf32>
    %256 = tpu.reciprocal %255 {approx = true} : vector<5x1xf32> -> vector<5x1xf32>
    %257 = vector.broadcast %256 : vector<5x1xf32> to vector<5x5xf32>
    %258 = arith.mulf %253, %257 : vector<5x5xf32>
    %cst_122 = arith.constant dense<0.000000e+00> : vector<5x16xf32>
    %259 = tpu.matmul %258, %245, %cst_122 {dimension_numbers = #tpu.dot_dimension_numbers<[1], [0], [0], [1], [0, 0, 1, 1], [], []>} : vector<5x5xf32>, vector<5x16xf32>, vector<5x16xf32> -> vector<5x16xf32>
    %c0_123 = arith.constant 0 : index
    %c16_124 = arith.constant 16 : index
    %260 = vector.load %arg24[%c0_123, %c16_124] : memref<10x32xf32, #tpu.memory_space<vmem>>, vector<5x16xf32>
    tpu.vector_store %arg24[%c0_123, %c16_124], %259 {strides = array<i32>} : memref<10x32xf32, #tpu.memory_space<vmem>>, vector<5x16xf32>,
    %261 = vector.extract_strided_slice %224 {offsets = [5, 0], sizes = [5, 16], strides = [1, 1]} : vector<10x96xf32> to vector<5x16xf32>
    %262 = vector.extract_strided_slice %224 {offsets = [5, 32], sizes = [5, 16], strides = [1, 1]} : vector<10x96xf32> to vector<5x16xf32>
    %263 = vector.extract_strided_slice %224 {offsets = [5, 64], sizes = [5, 16], strides = [1, 1]} : vector<10x96xf32> to vector<5x16xf32>
    %cst_125 = arith.constant dense<0.000000e+00> : vector<5x5xf32>
    %264 = tpu.matmul %261, %262, %cst_125 {dimension_numbers = #tpu.dot_dimension_numbers<[1], [1], [0], [0], [0, 0, 1, 0], [], []>} : vector<5x16xf32>, vector<5x16xf32>, vector<5x5xf32> -> vector<5x5xf32>
    %cst_126 = arith.constant 2.500000e-01 : f32
    %265 = vector.broadcast %cst_126 : f32 to vector<5x5xf32>
    %266 = arith.mulf %264, %265 : vector<5x5xf32>
    %cst_127 = arith.constant dense<0xFF800000> : vector<5xf32>
    %267 = vector.multi_reduction <maximumf>, %266, %cst_127 [1] : vector<5x5xf32> to vector<5xf32>
    %268 = vector.shape_cast %267 : vector<5xf32> to vector<5x1xf32>
    %269 = vector.broadcast %268 : vector<5x1xf32> to vector<5x5xf32>
    %270 = arith.subf %266, %269 : vector<5x5xf32>
    %271 = math.exp %270 : vector<5x5xf32>
    %cst_128 = arith.constant dense<0.000000e+00> : vector<5xf32>
    %272 = vector.multi_reduction <add>, %271, %cst_128 [1] : vector<5x5xf32> to vector<5xf32>
    %273 = vector.shape_cast %272 : vector<5xf32> to vector<5x1xf32>
    %274 = tpu.reciprocal %273 {approx = true} : vector<5x1xf32> -> vector<5x1xf32>
    %275 = vector.broadcast %274 : vector<5x1xf32> to vector<5x5xf32>
    %276 = arith.mulf %271, %275 : vector<5x5xf32>
    %cst_129 = arith.constant dense<0.000000e+00> : vector<5x16xf32>
    %277 = tpu.matmul %276, %263, %cst_129 {dimension_numbers = #tpu.dot_dimension_numbers<[1], [0], [0], [1], [0, 0, 1, 1], [], []>} : vector<5x5xf32>, vector<5x16xf32>, vector<5x16xf32> -> vector<5x16xf32>
    %c5_130 = arith.constant 5 : index
    %c0_131 = arith.constant 0 : index
    %278 = vector.load %arg24[%c5_130, %c0_131] : memref<10x32xf32, #tpu.memory_space<vmem>>, vector<5x16xf32>
    tpu.vector_store %arg24[%c5_130, %c0_131], %277 {strides = array<i32>} : memref<10x32xf32, #tpu.memory_space<vmem>>, vector<5x16xf32>,
    %279 = vector.extract_strided_slice %224 {offsets = [5, 16], sizes = [5, 16], strides = [1, 1]} : vector<10x96xf32> to vector<5x16xf32>
    %280 = vector.extract_strided_slice %224 {offsets = [5, 48], sizes = [5, 16], strides = [1, 1]} : vector<10x96xf32> to vector<5x16xf32>
    %281 = vector.extract_strided_slice %224 {offsets = [5, 80], sizes = [5, 16], strides = [1, 1]} : vector<10x96xf32> to vector<5x16xf32>
    %cst_132 = arith.constant dense<0.000000e+00> : vector<5x5xf32>
    %282 = tpu.matmul %279, %280, %cst_132 {dimension_numbers = #tpu.dot_dimension_numbers<[1], [1], [0], [0], [0, 0, 1, 0], [], []>} : vector<5x16xf32>, vector<5x16xf32>, vector<5x5xf32> -> vector<5x5xf32>
    %cst_133 = arith.constant 2.500000e-01 : f32
    %283 = vector.broadcast %cst_133 : f32 to vector<5x5xf32>
    %284 = arith.mulf %282, %283 : vector<5x5xf32>
    %cst_134 = arith.constant dense<0xFF800000> : vector<5xf32>
    %285 = vector.multi_reduction <maximumf>, %284, %cst_134 [1] : vector<5x5xf32> to vector<5xf32>
    %286 = vector.shape_cast %285 : vector<5xf32> to vector<5x1xf32>
    %287 = vector.broadcast %286 : vector<5x1xf32> to vector<5x5xf32>
    %288 = arith.subf %284, %287 : vector<5x5xf32>
    %289 = math.exp %288 : vector<5x5xf32>
    %cst_135 = arith.constant dense<0.000000e+00> : vector<5xf32>
    %290 = vector.multi_reduction <add>, %289, %cst_135 [1] : vector<5x5xf32> to vector<5xf32>
    %291 = vector.shape_cast %290 : vector<5xf32> to vector<5x1xf32>
    %292 = tpu.reciprocal %291 {approx = true} : vector<5x1xf32> -> vector<5x1xf32>
    %293 = vector.broadcast %292 : vector<5x1xf32> to vector<5x5xf32>
    %294 = arith.mulf %289, %293 : vector<5x5xf32>
    %cst_136 = arith.constant dense<0.000000e+00> : vector<5x16xf32>
    %295 = tpu.matmul %294, %281, %cst_136 {dimension_numbers = #tpu.dot_dimension_numbers<[1], [0], [0], [1], [0, 0, 1, 1], [], []>} : vector<5x5xf32>, vector<5x16xf32>, vector<5x16xf32> -> vector<5x16xf32>
    %c5_137 = arith.constant 5 : index
    %c16_138 = arith.constant 16 : index
    %296 = vector.load %arg24[%c5_137, %c16_138] : memref<10x32xf32, #tpu.memory_space<vmem>>, vector<5x16xf32>
    tpu.vector_store %arg24[%c5_137, %c16_138], %295 {strides = array<i32>} : memref<10x32xf32, #tpu.memory_space<vmem>>, vector<5x16xf32>,
    %c0_139 = arith.constant 0 : index
    %c0_140 = arith.constant 0 : index
    %297 = vector.load %arg24[%c0_139, %c0_140] : memref<10x32xf32, #tpu.memory_space<vmem>>, vector<10x32xf32>
    %c1_141 = arith.constant 1 : index
    %c0_142 = arith.constant 0 : index
    %c0_143 = arith.constant 0 : index
    %298 = vector.load %arg9[%c1_141, %c0_142, %c0_143] : memref<2x32x32xf32, #tpu.memory_space<vmem>>, vector<1x32x32xf32>
    %299 = vector.shape_cast %298 : vector<1x32x32xf32> to vector<32x32xf32>
    %cst_144 = arith.constant dense<0.000000e+00> : vector<10x32xf32>
    %300 = tpu.matmul %297, %299, %cst_144 {dimension_numbers = #tpu.dot_dimension_numbers<[1], [0], [0], [1], [0, 0, 1, 1], [], []>} : vector<10x32xf32>, vector<32x32xf32>, vector<10x32xf32> -> vector<10x32xf32>
    %301 = arith.addf %191, %300 : vector<10x32xf32>
    %c1_145 = arith.constant 1 : index
    %c0_146 = arith.constant 0 : index
    %c0_147 = arith.constant 0 : index
    %302 = vector.load %arg10[%c1_145, %c0_146, %c0_147] : memref<2x1x32xf32, #tpu.memory_space<vmem>>, vector<1x1x32xf32>
    %303 = vector.shape_cast %302 : vector<1x1x32xf32> to vector<1x32xf32>
    %304 = vector.broadcast %303 : vector<1x32xf32> to vector<10x32xf32>
    %305 = arith.addf %301, %304 : vector<10x32xf32>
    %c1_148 = arith.constant 1 : index
    %c0_149 = arith.constant 0 : index
    %c0_150 = arith.constant 0 : index
    %306 = vector.load %arg11[%c1_148, %c0_149, %c0_150] : memref<2x1x32xf32, #tpu.memory_space<vmem>>, vector<1x1x32xf32>
    %307 = vector.shape_cast %306 : vector<1x1x32xf32> to vector<1x32xf32>
    %c1_151 = arith.constant 1 : index
    %c0_152 = arith.constant 0 : index
    %c0_153 = arith.constant 0 : index
    %308 = vector.load %arg12[%c1_151, %c0_152, %c0_153] : memref<2x1x32xf32, #tpu.memory_space<vmem>>, vector<1x1x32xf32>
    %309 = vector.shape_cast %308 : vector<1x1x32xf32> to vector<1x32xf32>
    %cst_154 = arith.constant dense<0.000000e+00> : vector<10xf32>
    %310 = vector.multi_reduction <add>, %305, %cst_154 [1] : vector<10x32xf32> to vector<10xf32>
    %311 = vector.shape_cast %310 : vector<10xf32> to vector<10x1xf32>
    %cst_155 = arith.constant 3.200000e+01 : f32
    %312 = vector.broadcast %cst_155 : f32 to vector<10x1xf32>
    %313 = arith.divf %311, %312 : vector<10x1xf32>
    %314 = vector.broadcast %313 : vector<10x1xf32> to vector<10x32xf32>
    %315 = arith.subf %305, %314 : vector<10x32xf32>
    %316 = arith.mulf %315, %315 : vector<10x32xf32>
    %cst_156 = arith.constant dense<0.000000e+00> : vector<10xf32>
    %317 = vector.multi_reduction <add>, %316, %cst_156 [1] : vector<10x32xf32> to vector<10xf32>
    %318 = vector.shape_cast %317 : vector<10xf32> to vector<10x1xf32>
    %cst_157 = arith.constant 3.200000e+01 : f32
    %319 = vector.broadcast %cst_157 : f32 to vector<10x1xf32>
    %320 = arith.divf %318, %319 : vector<10x1xf32>
    %321 = vector.broadcast %313 : vector<10x1xf32> to vector<10x32xf32>
    %322 = arith.subf %305, %321 : vector<10x32xf32>
    %cst_158 = arith.constant 9.99999974E-6 : f32
    %323 = vector.broadcast %cst_158 : f32 to vector<10x1xf32>
    %324 = arith.addf %320, %323 : vector<10x1xf32>
    %325 = math.rsqrt %324 : vector<10x1xf32>
    %326 = vector.broadcast %325 : vector<10x1xf32> to vector<10x32xf32>
    %327 = arith.mulf %322, %326 : vector<10x32xf32>
    %328 = vector.broadcast %307 : vector<1x32xf32> to vector<10x32xf32>
    %329 = arith.mulf %327, %328 : vector<10x32xf32>
    %330 = vector.broadcast %309 : vector<1x32xf32> to vector<10x32xf32>
    %331 = arith.addf %329, %330 : vector<10x32xf32>
    %c1_159 = arith.constant 1 : index
    %c0_160 = arith.constant 0 : index
    %c0_161 = arith.constant 0 : index
    %332 = vector.load %arg13[%c1_159, %c0_160, %c0_161] : memref<2x32x64xf32, #tpu.memory_space<vmem>>, vector<1x32x64xf32>
    %333 = vector.shape_cast %332 : vector<1x32x64xf32> to vector<32x64xf32>
    %cst_162 = arith.constant dense<0.000000e+00> : vector<10x64xf32>
    %334 = tpu.matmul %331, %333, %cst_162 {dimension_numbers = #tpu.dot_dimension_numbers<[1], [0], [0], [1], [0, 0, 1, 1], [], []>} : vector<10x32xf32>, vector<32x64xf32>, vector<10x64xf32> -> vector<10x64xf32>
    %c1_163 = arith.constant 1 : index
    %c0_164 = arith.constant 0 : index
    %c0_165 = arith.constant 0 : index
    %335 = vector.load %arg14[%c1_163, %c0_164, %c0_165] : memref<2x1x64xf32, #tpu.memory_space<vmem>>, vector<1x1x64xf32>
    %336 = vector.shape_cast %335 : vector<1x1x64xf32> to vector<1x64xf32>
    %337 = vector.broadcast %336 : vector<1x64xf32> to vector<10x64xf32>
    %338 = arith.addf %334, %337 : vector<10x64xf32>
    %cst_166 = arith.constant 1.702000e+00 : f32
    %339 = vector.broadcast %cst_166 : f32 to vector<10x64xf32>
    %340 = arith.mulf %339, %338 : vector<10x64xf32>
    %341 = arith.negf %340 : vector<10x64xf32>
    %342 = math.exp %341 : vector<10x64xf32>
    %cst_167 = arith.constant 1.000000e+00 : f32
    %343 = vector.broadcast %cst_167 : f32 to vector<10x64xf32>
    %344 = arith.addf %343, %342 : vector<10x64xf32>
    %345 = arith.divf %343, %344 : vector<10x64xf32>
    %346 = arith.mulf %338, %345 : vector<10x64xf32>
    %c1_168 = arith.constant 1 : index
    %c0_169 = arith.constant 0 : index
    %c0_170 = arith.constant 0 : index
    %347 = vector.load %arg15[%c1_168, %c0_169, %c0_170] : memref<2x64x32xf32, #tpu.memory_space<vmem>>, vector<1x64x32xf32>
    %348 = vector.shape_cast %347 : vector<1x64x32xf32> to vector<64x32xf32>
    %cst_171 = arith.constant dense<0.000000e+00> : vector<10x32xf32>
    %349 = tpu.matmul %346, %348, %cst_171 {dimension_numbers = #tpu.dot_dimension_numbers<[1], [0], [0], [1], [0, 0, 1, 1], [], []>} : vector<10x64xf32>, vector<64x32xf32>, vector<10x32xf32> -> vector<10x32xf32>
    %350 = arith.addf %305, %349 : vector<10x32xf32>
    %c1_172 = arith.constant 1 : index
    %c0_173 = arith.constant 0 : index
    %c0_174 = arith.constant 0 : index
    %351 = vector.load %arg16[%c1_172, %c0_173, %c0_174] : memref<2x1x32xf32, #tpu.memory_space<vmem>>, vector<1x1x32xf32>
    %352 = vector.shape_cast %351 : vector<1x1x32xf32> to vector<1x32xf32>
    %353 = vector.broadcast %352 : vector<1x32xf32> to vector<10x32xf32>
    %354 = arith.addf %350, %353 : vector<10x32xf32>
    %c0_175 = arith.constant 0 : index
    %c0_176 = arith.constant 0 : index
    %355 = vector.load %arg20[%c0_175, %c0_176] : memref<2x10xf32, #tpu.memory_space<vmem>>, vector<2x10xf32>
    %cst_177 = arith.constant dense<0.000000e+00> : vector<2x32xf32>
    %356 = tpu.matmul %355, %354, %cst_177 {dimension_numbers = #tpu.dot_dimension_numbers<[1], [0], [0], [1], [0, 0, 1, 1], [], []>} : vector<2x10xf32>, vector<10x32xf32>, vector<2x32xf32> -> vector<2x32xf32>
    %c0_178 = arith.constant 0 : index
    %c0_179 = arith.constant 0 : index
    %357 = vector.load %arg17[%c0_178, %c0_179] : memref<1x32xf32, #tpu.memory_space<vmem>>, vector<1x32xf32>
    %c0_180 = arith.constant 0 : index
    %c0_181 = arith.constant 0 : index
    %358 = vector.load %arg18[%c0_180, %c0_181] : memref<1x32xf32, #tpu.memory_space<vmem>>, vector<1x32xf32>
    %cst_182 = arith.constant dense<0.000000e+00> : vector<2xf32>
    %359 = vector.multi_reduction <add>, %356, %cst_182 [1] : vector<2x32xf32> to vector<2xf32>
    %360 = vector.shape_cast %359 : vector<2xf32> to vector<2x1xf32>
    %cst_183 = arith.constant 3.200000e+01 : f32
    %361 = vector.broadcast %cst_183 : f32 to vector<2x1xf32>
    %362 = arith.divf %360, %361 : vector<2x1xf32>
    %363 = vector.broadcast %362 : vector<2x1xf32> to vector<2x32xf32>
    %364 = arith.subf %356, %363 : vector<2x32xf32>
    %365 = arith.mulf %364, %364 : vector<2x32xf32>
    %cst_184 = arith.constant dense<0.000000e+00> : vector<2xf32>
    %366 = vector.multi_reduction <add>, %365, %cst_184 [1] : vector<2x32xf32> to vector<2xf32>
    %367 = vector.shape_cast %366 : vector<2xf32> to vector<2x1xf32>
    %cst_185 = arith.constant 3.200000e+01 : f32
    %368 = vector.broadcast %cst_185 : f32 to vector<2x1xf32>
    %369 = arith.divf %367, %368 : vector<2x1xf32>
    %370 = vector.broadcast %362 : vector<2x1xf32> to vector<2x32xf32>
    %371 = arith.subf %356, %370 : vector<2x32xf32>
    %cst_186 = arith.constant 9.99999974E-6 : f32
    %372 = vector.broadcast %cst_186 : f32 to vector<2x1xf32>
    %373 = arith.addf %369, %372 : vector<2x1xf32>
    %374 = math.rsqrt %373 : vector<2x1xf32>
    %375 = vector.broadcast %374 : vector<2x1xf32> to vector<2x32xf32>
    %376 = arith.mulf %371, %375 : vector<2x32xf32>
    %377 = vector.broadcast %357 : vector<1x32xf32> to vector<2x32xf32>
    %378 = arith.mulf %376, %377 : vector<2x32xf32>
    %379 = vector.broadcast %358 : vector<1x32xf32> to vector<2x32xf32>
    %380 = arith.addf %378, %379 : vector<2x32xf32>
    %c0_187 = arith.constant 0 : index
    %c0_188 = arith.constant 0 : index
    %381 = vector.load %arg19[%c0_187, %c0_188] : memref<32x16xf32, #tpu.memory_space<vmem>>, vector<32x16xf32>
    %cst_189 = arith.constant dense<0.000000e+00> : vector<2x16xf32>
    %382 = tpu.matmul %380, %381, %cst_189 {dimension_numbers = #tpu.dot_dimension_numbers<[1], [0], [0], [1], [0, 0, 1, 1], [], []>} : vector<2x32xf32>, vector<32x16xf32>, vector<2x16xf32> -> vector<2x16xf32>
    %383 = arith.mulf %382, %382 : vector<2x16xf32>
    %cst_190 = arith.constant dense<0.000000e+00> : vector<2xf32>
    %384 = vector.multi_reduction <add>, %383, %cst_190 [1] : vector<2x16xf32> to vector<2xf32>
    %385 = vector.shape_cast %384 : vector<2xf32> to vector<2x1xf32>
    %386 = math.rsqrt %385 : vector<2x1xf32>
    %387 = vector.broadcast %386 : vector<2x1xf32> to vector<2x16xf32>
    %388 = arith.mulf %382, %387 : vector<2x16xf32>
    %c0_191 = arith.constant 0 : index
    %c0_192 = arith.constant 0 : index
    %389 = vector.load %arg22[%c0_191, %c0_192] : memref<1x1xf32, #tpu.memory_space<vmem>>, vector<1x1xf32>
    %c0_193 = arith.constant 0 : index
    %c0_194 = arith.constant 0 : index
    %390 = vector.load %arg21[%c0_193, %c0_194] : memref<16x128xf32, #tpu.memory_space<vmem>>, vector<16x128xf32>
    %cst_195 = arith.constant dense<0.000000e+00> : vector<2x128xf32>
    %391 = tpu.matmul %388, %390, %cst_195 {dimension_numbers = #tpu.dot_dimension_numbers<[1], [0], [0], [1], [0, 0, 1, 1], [], []>} : vector<2x16xf32>, vector<16x128xf32>, vector<2x128xf32> -> vector<2x128xf32>
    %392 = vector.broadcast %389 : vector<1x1xf32> to vector<2x128xf32>
    %393 = arith.mulf %392, %391 : vector<2x128xf32>
    %c0_196 = arith.constant 0 : index
    %c0_197 = arith.constant 0 : index
    %394 = vector.load %arg23[%c0_196, %c0_197] : memref<2x128xf32, #tpu.memory_space<vmem>>, vector<2x128xf32>
    tpu.vector_store %arg23[%c0_196, %c0_197], %393 {strides = array<i32>} : memref<2x128xf32, #tpu.memory_space<vmem>>, vector<2x128xf32>,
    return
  }
}

</mosaic_0001>

<bundles_post_ra>
// kernel: tile.9
= control target key start
LH: loop header
LB: loop body
LE: loop exit
PB: predicated region body
PF: predicated region fallthrough
CT: control target
= control target key end

     0   :  { %vm3_vm0 = vcmask 261120   ;;  %s34_s0 = inlined_call_operand.vmem [shape: f32[2,5,32], index: 0, kind: input, shape index: {}]   ;;  %s35_s1 = inlined_call_operand.vmem [shape: f32[10,32], index: 1, kind: output, shape index: {}]  }
   0x1   :  { %v2_v0 = vld [vmem:[%s34_s0] sm:$0x1f]   ;;  %v10_v1 = vld [vmem:[%s34_s0 + $0x8] sm:$0x1f]  }
   0x2   :  { %4 = vst.msk [vmem:[%s35_s1] sm:$0x1f] %vm3_vm0, %v2_v0   ;;  %11 = vst.msk [vmem:[%s35_s1 + $0x5] sm:$0x1f] %vm3_vm0, %v10_v1  }

// kernel: myclip_forward.1
= control target key start
LH: loop header
LB: loop body
LE: loop exit
PB: predicated region body
PF: predicated region fallthrough
CT: control target
= control target key end

     0   :  { %s4117_s0 = inlined_call_operand.vmem [shape: f32[10,192], index: 0, kind: input, shape index: {}]   ;;  %s4118_s1 = inlined_call_operand.vmem [shape: f32[192,32], index: 1, kind: input, shape index: {}]   ;;  %s4119_s2 = inlined_call_operand.vmem [shape: f32[10,32], index: 2, kind: input, shape index: {}]   ;;  %s4120_s3 = inlined_call_operand.vmem [shape: f32[1,32], index: 3, kind: input, shape index: {}]   ;;  %s4121_s4 = inlined_call_operand.vmem [shape: f32[1,32], index: 4, kind: input, shape index: {}]   ;;  %s4122_s5 = inlined_call_operand.vmem [shape: f32[2,1,32], index: 5, kind: input, shape index: {}]   ;;  %s4123_s6 = inlined_call_operand.vmem [shape: f32[2,1,32], index: 6, kind: input, shape index: {}]   ;;  %s4124_s7 = inlined_call_operand.vmem [shape: f32[2,32,96], index: 7, kind: input, shape index: {}]   ;;  %s4125_s8 = inlined_call_operand.vmem [shape: f32[2,1,96], index: 8, kind: input, shape index: {}]   ;;  %s4126_s9 = inlined_call_operand.vmem [shape: f32[2,32,32], index: 9, kind: input, shape index: {}]   ;;  %s4127_s10 = inlined_call_operand.vmem [shape: f32[2,1,32], index: 10, kind: input, shape index: {}]   ;;  %s4128_s11 = inlined_call_operand.vmem [shape: f32[2,1,32], index: 11, kind: input, shape index: {}]   ;;  %s4129_s12 = inlined_call_operand.vmem [shape: f32[2,1,32], index: 12, kind: input, shape index: {}]   ;;  %s4130_s13 = inlined_call_operand.vmem [shape: f32[2,32,64], index: 13, kind: input, shape index: {}]   ;;  %s4131_s14 = inlined_call_operand.vmem [shape: f32[2,1,64], index: 14, kind: input, shape index: {}]   ;;  %s4132_s15 = inlined_call_operand.vmem [shape: f32[2,64,32], index: 15, kind: input, shape index: {}]   ;;  %s4133_s16 = inlined_call_operand.vmem [shape: f32[2,1,32], index: 16, kind: input, shape index: {}]   ;;  %s4134_s17 = inlined_call_operand.vmem [shape: f32[1,32], index: 17, kind: input, shape index: {}]   ;;  %s4135_s18 = inlined_call_operand.vmem [shape: f32[1,32], index: 18, kind: input, shape index: {}]   ;;  %s4136_s19 = inlined_call_operand.vmem [shape: f32[32,16], index: 19, kind: input, shape index: {}]   ;;  %s4137_s20 = inlined_call_operand.vmem [shape: f32[2,10], index: 20, kind: input, shape index: {}]   ;;  %s4138_s21 = inlined_call_operand.vmem [shape: f32[16,128], index: 21, kind: input, shape index: {}]   ;;  %s4139_s22 = inlined_call_operand.<no memory space> [shape: f32[1,1], index: 22, kind: input, shape index: {}]   ;;  %s4140_s23 = inlined_call_operand.hbm [shape: f32[2,128], index: 23, kind: output, shape index: {}]  }
   0x1   :  { %4149 = sst [smem:[#allocation7_spill]] %s4117_s0  ;;  %v28_v0 = vstv %s4139_s22 }
   0x2   :  { %4150 = sst [smem:[#allocation8_spill]] %s4118_s1  ;;  %29 = vst [vmem:[#allocation3] sm:$0x1] %v28_v0 }
   0x3   :  { %4151 = sst [smem:[#allocation9_spill]] %s4119_s2 }
   0x4   :  { %4152 = sst [smem:[#allocation10_spill]] %s4120_s3 }
   0x5   :  { %4153 = sst [smem:[#allocation11_spill]] %s4121_s4 }
   0x6   :  { %4154 = sst [smem:[#allocation12_spill]] %s4122_s5 }
   0x7   :  { %4155 = sst [smem:[#allocation13_spill]] %s4123_s6 }
   0x8   :  { %4156 = sst [smem:[#allocation14_spill]] %s4124_s7 }
   0x9   :  { %s4157_s5 = sld [smem:[#allocation8_spill]]  ;;  %v3403_v2 = vmov 0.0   ;;  %vm107_vm0 = vcmask 523264  }
   0xa   :  { %114 = vmatprep.subr.mxu0 %v3403_v2  ;;  %s4158_s0 = sld [smem:[#allocation7_spill]] }
   0xf   :  { %v96_v1 = vld [vmem:[%s4157_s5 + $0x78] sm:$0xff]  ;;  %v95_v3 = vld [vmem:[%s4157_s5 + $0x70] sm:$0xff]  ;;  %v94_v4 = vld [vmem:[%s4157_s5 + $0x68] sm:$0xff] }
  0x10   :  { %115 = vmatpush1.msra.mxu0 %v96_v1  ;;  %v93_v5 = vld [vmem:[%s4157_s5 + $0x60] sm:$0xff]  ;;  %v92_v6 = vld [vmem:[%s4157_s5 + $0x58] sm:$0xff]  ;;  %v78_v7 = vld [vmem:[%s4158_s0 + $0x8] sm:$0xff] }
  0x11   :  { %116 = vmatprep.subr.mxu0 %v3403_v2  ;;  %v91_v8 = vld [vmem:[%s4157_s5 + $0x50] sm:$0xff]  ;;  %2882 = vmatprep.mubr.msk.f32.mxu0 %vm107_vm0, %v78_v7 }
  0x12   :  { %117 = vmatpush1.msra.mxu0 %v95_v3 }
  0x13   :  { %118 = vmatprep.subr.mxu0 %v3403_v2 }
  0x14   :  { %119 = vmatpush1.msra.mxu0 %v94_v4 }
  0x15   :  { %120 = vmatprep.subr.mxu0 %v3403_v2 }
  0x16   :  { %121 = vmatpush1.msra.mxu0 %v93_v5 }
  0x17   :  { %122 = vmatprep.subr.mxu0 %v3403_v2 }
  0x18   :  { %30 = vsyncpa [#allocation5], 0  ;;  %123 = vmatpush1.msra.mxu0 %v92_v6  ;;  %v90_v9 = vld [vmem:[%s4157_s5 + $0x48] sm:$0xff]  ;;  %v89_v10 = vld [vmem:[%s4157_s5 + $0x40] sm:$0xff]  ;;  %s4159_s25 = sld [smem:[#allocation9_spill]]  ;;  %vm191_vm1 = vcmask 261120  }
  0x19   :  { %124 = vmatprep.subr.mxu0 %v3403_v2  ;;  %v88_v11 = vld [vmem:[%s4157_s5 + $0x38] sm:$0xff]  ;;  %v87_v12 = vld [vmem:[%s4157_s5 + $0x30] sm:$0xff]  ;;  %v86_v13 = vld [vmem:[%s4157_s5 + $0x28] sm:$0xff]  ;;  %vm195_vm2 = vcmask 254976   ;;  %s4160_s6 = sld [smem:[#allocation10_spill]]  ;;  %vm3404_vm3 = vmmov 0  }
  0x1a   :  { %125 = vmatpush1.msra.mxu0 %v91_v8  ;;  %v85_v14 = vld [vmem:[%s4157_s5 + $0x20] sm:$0xff]  ;;  %v84_v15 = vld [vmem:[%s4157_s5 + $0x18] sm:$0xff]  ;;  %v83_v16 = vld [vmem:[%s4157_s5 + $0x10] sm:$0xff]  ;;  %s4161_s7 = sld [smem:[#allocation11_spill]]  ;;  %s3405_s29 = smov 96   ;;  %vm375_vm4 = vcmask 130048  }
  0x1b   :  { %126 = vmatprep.subr.mxu0 %v3403_v2  ;;  %v82_v17 = vld [vmem:[%s4157_s5 + $0x8] sm:$0xff]  ;;  %v81_v18 = vld [vmem:[%s4157_s5] sm:$0xff]  ;;  %v104_v19 = vld [vmem:[%s4157_s5 + $0xb8] sm:$0xff]  ;;  %s4162_s3 = sld [smem:[#allocation14_spill]]  ;;  %s3406_s4 = smov 80   ;;  %vm451_vm5 = vcmask 36864  }
  0x1c   :  { %127 = vmatpush1.msra.mxu0 %v90_v9  ;;  %v103_v20 = vld [vmem:[%s4157_s5 + $0xb0] sm:$0xff]  ;;  %v102_v21 = vld [vmem:[%s4157_s5 + $0xa8] sm:$0xff]  ;;  %v101_v22 = vld [vmem:[%s4157_s5 + $0xa0] sm:$0xff]  ;;  %s4163_s2 = sld [smem:[#allocation12_spill]]  ;;  %s4147_s30 = smov 64   ;;  %vm469_vm6 = vcmask 1044480  }
  0x1d   :  { %128 = vmatprep.subr.mxu0 %v3403_v2  ;;  %v100_v23 = vld [vmem:[%s4157_s5 + $0x98] sm:$0xff]  ;;  %v99_v24 = vld [vmem:[%s4157_s5 + $0x90] sm:$0xff]  ;;  %v98_v25 = vld [vmem:[%s4157_s5 + $0x88] sm:$0xff]  ;;  %s4164_s27 = sld [smem:[#allocation13_spill]]  ;;  %vm465_vm7 = vcmask 39936   ;;  %vm542_vm8 = vcmask 126976  }
  0x1e   :  { %129 = vmatpush1.msra.mxu0 %v89_v10  ;;  %v97_v26 = vld [vmem:[%s4157_s5 + $0x80] sm:$0xff]  ;;  %v80_v28 = vld [vmem:[%s4158_s0 + $0x18] sm:$0x3]  ;;  %v79_v29 = vld [vmem:[%s4158_s0 + $0x10] sm:$0x3]  ;;  %s3408_s5 = smov 112  }
  0x1f   :  { %130 = vmatprep.subr.mxu0 %v3403_v2  ;;  %v77_v27 = vld [vmem:[%s4158_s0] sm:$0xff]  ;;  %v106_v34 = vld [vmem:[%s4159_s25 + $0x8] sm:$0x3]  ;;  %s3409_s24 = smov 48   ;;  %vm718_vm9 = vcmask 1042432   ;;  %vm715_vm10 = vcmask 258176  }
  0x20   :  { %131 = vmatpush1.msra.mxu0 %v88_v11  ;;  %v105_v30 = vld [vmem:[%s4159_s25] sm:$0xff]  ;;  %s3410_s25 = smov 16   ;;  %vm2594_vm11 = vcmask 1041408   ;;  %vm2590_vm12 = vcmask 80896   ;;  %vm2775_vm13 = vcmask 123904  }
  0x21   :  { %132 = vmatprep.subr.mxu0 %v3403_v2  ;;  %v2884_v57 = vld [vmem:[%s4160_s6] ss:$0 sm:$0xff] }
  0x22   :  { %133 = vmatpush1.msra.mxu0 %v87_v12  ;;  %v2885_v59 = vld [vmem:[%s4161_s7] ss:$0 sm:$0xff] }
  0x23   :  { %134 = vmatprep.subr.mxu0 %v3403_v2 }
  0x24   :  { %135 = vmatpush1.msra.mxu0 %v86_v13 }
  0x25   :  { %136 = vmatprep.subr.mxu0 %v3403_v2 }
  0x26   :  { %137 = vmatpush1.msra.mxu0 %v85_v14 }
  0x27   :  { %138 = vmatprep.subr.mxu0 %v3403_v2 }
  0x28   :  { %139 = vmatpush1.msra.mxu0 %v84_v15  ;;  %v283_v15 = vld [vmem:[%s4162_s3 + $0x18] sm:$0xff] }
  0x29   :  { %140 = vmatprep.subr.mxu0 %v3403_v2  ;;  %3088 = vmatprep.subr.mxu1 %v283_v15 }
  0x2a   :  { %141 = vmatpush1.msra.mxu0 %v83_v16  ;;  %v282_v16 = vld [vmem:[%s4162_s3 + $0x10] sm:$0xff]  ;;  %3089 = vmatpush3.msra.mxu1 %v283_v15 }
  0x2b   :  { %142 = vmatprep.subr.mxu0 %v3403_v2  ;;  %3090 = vmatprep.subr.mxu1 %v282_v16 }
  0x2c   :  { %143 = vmatpush1.msra.mxu0 %v82_v17  ;;  %v281_v17 = vld [vmem:[%s4162_s3 + $0x8] sm:$0xff]  ;;  %3091 = vmatpush3.msra.mxu1 %v282_v16 }
  0x2d   :  { %144 = vmatprep.subr.mxu0 %v3403_v2  ;;  %3092 = vmatprep.subr.mxu1 %v281_v17 }
  0x2e   :  { %145 = vmatpush1.msra.mxu0 %v81_v18  ;;  %3093 = vmatpush3.msra.mxu1 %v281_v17  ;;  %v280_v18 = vld [vmem:[%s4162_s3] sm:$0xff] }
  0x2f   :  { %162 = vmatprep.subr.mxu0 %v3403_v2  ;;  %3094 = vmatprep.subr.mxu1 %v280_v18 }
  0x30   :  { %163 = vmatpush2.msra.mxu0 %v104_v19  ;;  %3095 = vmatpush3.msra.mxu1 %v280_v18 }
  0x31   :  { %164 = vmatprep.subr.mxu0 %v3403_v2  ;;  %3099 = vmatprep.subr.mxu1 %v3403_v2 }
  0x32   :  { %165 = vmatpush2.msra.mxu0 %v103_v20 }
  0x33   :  { %166 = vmatprep.subr.mxu0 %v3403_v2 }
  0x34   :  { %167 = vmatpush2.msra.mxu0 %v102_v21 }
  0x35   :  { %168 = vmatprep.subr.mxu0 %v3403_v2 }
  0x36   :  { %169 = vmatpush2.msra.mxu0 %v101_v22 }
  0x37   :  { %170 = vmatprep.subr.mxu0 %v3403_v2 }
  0x38   :  { %171 = vmatpush2.msra.mxu0 %v100_v23 }
  0x39   :  { %172 = vmatprep.subr.mxu0 %v3403_v2 }
  0x3a   :  { %173 = vmatpush2.msra.mxu0 %v99_v24 }
  0x3b   :  { %174 = vmatprep.subr.mxu0 %v3403_v2 }
  0x3c   :  { %175 = vmatpush2.msra.mxu0 %v98_v25 }
  0x3d   :  { %176 = vmatprep.subr.mxu0 %v3403_v2 }
  0x3e   :  { %177 = vmatpush2.msra.mxu0 %v97_v26  ;;  %v2886_v26 = vld [vmem:[%s4163_s2] ss:$0 sm:$0xff] }
  0x3f   :  { %179 = vmatmul.mubr.f32.vlgmr.msra.gmra.mxu0 %v77_v27 }
  0x40   :  { %2883 = vmatprep.mubr.msk.f32.mxu0 %vm107_vm0, %v80_v28  ;;  %v2887_v28 = vld [vmem:[%s4164_s27] ss:$0 sm:$0xff] }
  0x43   :  { %184 = vmatmul.mubr.f32.gmra.mxu0 %v79_v29 }
  0xff   :  { %v180_v31 = vpop.f32.mrf.mxu0 }
 0x100   :  { %v181_v32 = vadd.f32 %v180_v31, %v105_v30 }
 0x101   :  { %v182_v33 = vpop.f32.mrf.mxu0 }
 0x102   :  { %v192_v35 = vsel %vm191_vm1, %v181_v32, 0.0 }
 0x103   :  { %v185_v36 = vpop.f32.mrf.mxu0  ;;  %193 = vadd.xlane.f32.xlu0 %v192_v35  ;;  %v2888_v35 = vld [vmem:[%s4125_s8] ss:$0 sm:$0xff] }
 0x104   :  { %v186_v37 = vadd.f32 %v185_v36, %v106_v34 }
 0x105   :  { %v187_v38 = vpop.f32.mrf.mxu0 }
 0x106   :  { %v196_v39 = vsel %vm195_vm2, %v186_v37, 0.0 }
 0x107   :  { %197 = vadd.xlane.f32.xlu0 %v196_v39 }
 0x18c   :  { %v194_v40 = vpop.xlane.xlu0 %193 }
 0x18d   :  { %v200_v41 = vmul.f32 0.03125, %v194_v40 }
 0x18f   :  { %v202_v42 = vsub.f32 %v181_v32, %v200_v41 }
 0x190   :  { %v198_v43 = vpop.xlane.xlu0 %197 }
 0x191   :  { %v201_v44 = vmul.f32 0.03125, %v198_v43  ;;  %v204_v45 = vmul.f32 %v202_v42, %v202_v42 }
 0x193   :  { %v203_v46 = vsub.f32 %v186_v37, %v201_v44  ;;  %v206_v47 = vsel %vm191_vm1, %v204_v45, 0.0 }
 0x194   :  { %207 = vadd.xlane.f32.xlu1 %v206_v47 }
 0x195   :  { %v205_v48 = vmul.f32 %v203_v46, %v203_v46 }
 0x197   :  { %v209_v49 = vsel %vm195_vm2, %v205_v48, 0.0 }
 0x198   :  { %210 = vadd.xlane.f32.xlu1 %v209_v49 }
 0x21d   :  { %v208_v50 = vpop.xlane.xlu1 %207 }
 0x21e   :  { %v212_v51 = vmul.f32 0.03125, %v208_v50 }
 0x220   :  { %v214_v52 = vadd.f32 1e-05, %v212_v51 }
 0x221   :  { %v211_v53 = vpop.xlane.xlu1 %210 }
 0x222   :  { %3309 = vrsqrt.f32 %v214_v52  ;;  %v213_v54 = vmul.f32 0.03125, %v211_v53 }
 0x224   :  { %v215_v55 = vadd.f32 1e-05, %v213_v54 }
 0x226   :  { %3311 = vrsqrt.f32 %v215_v55 }
 0x22f   :  { %v3310_v56 = vpop.eup %3309 }
 0x230   :  { %v218_v58 = vmul.f32 %v3310_v56, %v202_v42 }
 0x232   :  { %v226_v60 = vmul.f32 %v2884_v57, %v218_v58 }
 0x233   :  { %v3312_v61 = vpop.eup %3311 }
 0x234   :  { %v3662_v62 = vadd.f32 %v2885_v59, %v226_v60  ;;  %v219_v63 = vmul.f32 %v3312_v61, %v203_v46 }
 0x236   :  { %v238_v0 = vsel %vm191_vm1, %v3662_v62, 0.0  ;;  %v227_v1 = vmul.f32 %v2884_v57, %v219_v63 }
 0x237   :  { %239 = vadd.xlane.f32.xlu0 %v238_v0 }
 0x238   :  { %v3666_v3 = vadd.f32 %v2885_v59, %v227_v1 }
 0x23a   :  { %v241_v4 = vsel %vm195_vm2, %v3666_v3, 0.0 }
 0x23b   :  { %242 = vadd.xlane.f32.xlu1 %v241_v4 }
 0x2c0   :  { %v240_v5 = vpop.xlane.xlu0 %239 }
 0x2c1   :  { %v244_v6 = vmul.f32 0.03125, %v240_v5 }
 0x2c3   :  { %v246_v7 = vsub.f32 %v3662_v62, %v244_v6 }
 0x2c4   :  { %v243_v8 = vpop.xlane.xlu1 %242 }
 0x2c5   :  { %v245_v9 = vmul.f32 0.03125, %v243_v8  ;;  %v248_v10 = vmul.f32 %v246_v7, %v246_v7 }
 0x2c7   :  { %v247_v11 = vsub.f32 %v3666_v3, %v245_v9  ;;  %v250_v12 = vsel %vm191_vm1, %v248_v10, 0.0 }
 0x2c8   :  { %251 = vadd.xlane.f32.xlu0 %v250_v12 }
 0x2c9   :  { %v249_v13 = vmul.f32 %v247_v11, %v247_v11 }
 0x2cb   :  { %v253_v14 = vsel %vm195_vm2, %v249_v13, 0.0 }
 0x2cc   :  { %254 = vadd.xlane.f32.xlu1 %v253_v14 }
 0x351   :  { %v252_v19 = vpop.xlane.xlu0 %251 }
 0x352   :  { %v256_v20 = vmul.f32 0.03125, %v252_v19 }
 0x354   :  { %v258_v21 = vadd.f32 1e-05, %v256_v20 }
 0x355   :  { %v255_v22 = vpop.xlane.xlu1 %254 }
 0x356   :  { %3313 = vrsqrt.f32 %v258_v21  ;;  %v257_v23 = vmul.f32 0.03125, %v255_v22 }
 0x358   :  { %v259_v24 = vadd.f32 1e-05, %v257_v23 }
 0x35a   :  { %3315 = vrsqrt.f32 %v259_v24 }
 0x363   :  { %v3314_v25 = vpop.eup %3313 }
 0x364   :  { %v262_v27 = vmul.f32 %v3314_v25, %v246_v7 }
 0x366   :  { %v270_v29 = vmul.f32 %v2886_v26, %v262_v27 }
 0x367   :  { %v3316_v30 = vpop.eup %3315 }
 0x368   :  { %v263_v31 = vmul.f32 %v3316_v30, %v247_v11  ;;  %v278_v32 = vadd.f32 %v2887_v28, %v270_v29 }
 0x36a   :  { %v271_v33 = vmul.f32 %v2886_v26, %v263_v31  ;;  %3096 = vmatprep.mubr.msk.f32.mxu1 %vm191_vm1, %v278_v32 }
 0x36c   :  { %v279_v34 = vadd.f32 %v2887_v28, %v271_v33 }
 0x36e   :  { %3097 = vmatmul.mubr.msk.f32.vlgmr.msra.gmra.mxu1 %vm191_vm1, %v279_v34 }
 0x36f   :  { %3101 = vmatprep.mubr.msk.f32.mxu1 %vm3404_vm3, %v3403_v2 }
 0x42e   :  { %v3098_v36 = vpop.f32.mrf.mxu1 }
 0x42f   :  { %v3700_v37 = vadd.f32 %v3098_v36, %v2888_v35 }
 0x430   :  { %v363_v38 = vpop.f32.mrf.mxu1 }
 0x431   :  { %v3702_v39 = vadd.f32 %v2888_v35, %v363_v38  ;;  %v720_v8 = vrot.slane %v3700_v37, 5 }
 0x433   :  { %373 = vrot.lane.b32.xlu0 %v3702_v39, %s3405_s29  ;;  %v719_v7 = vrot.slane %v3702_v39, 5 }
 0x435   :  { %v3740_v9 = vsel %vm718_vm9, %v719_v7, %v720_v8 }
 0x437   :  { %546 = vrot.lane.b32.xlu0 %v3702_v39, %s3406_s4 }
 0x4a5   :  { %v374_v40 = vpop.permute.xlu0 %373 }
 0x4a6   :  { %3100 = vmatpush3.xpose.msk.msra.mxu1 %vm375_vm4, %v374_v40 }
 0x4a7   :  { %3104 = vmatprep.subr.mxu1 %v3403_v2 }
 0x4a9   :  { %3102 = vmatmul.mubr.msk.f32.vlgmr.msra.gmra.mxu1 %vm375_vm4, %v3702_v39  ;;  %v547_v54 = vpop.permute.xlu0 %546 }
 0x4aa   :  { %3106 = vmatprep.mubr.msk.f32.mxu1 %vm3404_vm3, %v3403_v2 }
 0x569   :  { %v446_v41 = vpop.f32.mrf.mxu1 }
 0x56a   :  { %v450_v42 = vmul.f32 0.25, %v446_v41 }
 0x56b   :  { %v3103_v43 = vpop.f32.mrf.mxu1 }
 0x56c   :  { %v452_v44 = vsel %vm451_vm5, %v450_v42, -inf }
 0x56d   :  { %453 = vmax.xlane.f32.xlu1 %v452_v44 }
 0x57e   :  { %463 = vrot.lane.b32.xlu1 %v3702_v39, %s4147_s30 }
 0x5f6   :  { %v454_v45 = vpop.xlane.xlu1 %453 }
 0x5f7   :  { %v455_v46 = vsub.f32 %v450_v42, %v454_v45 }
 0x5f9   :  { %v456_v47 = vmul.f32 1.442695, %v455_v46 }
 0x5fa   :  { %v464_v48 = vpop.permute.xlu1 %463 }
 0x5fb   :  { %3317 = vpow2.f32 %v456_v47  ;;  %3105 = vmatpush3.msk.msra.mxu1 %vm469_vm6, %v464_v48  ;;  %v1065_v47 = vld [vmem:[%s4126_s9 + $0x18] sm:$0xff]  ;;  %v1064_v48 = vld [vmem:[%s4126_s9 + $0x10] sm:$0xff] }
 0x5fc   :  { %3109 = vmatprep.subr.mxu1 %v3403_v2 }
 0x608   :  { %v3318_v49 = vpop.eup %3317 }
 0x609   :  { %v458_v50 = vsel %vm451_vm5, %v3318_v49, 0.0 }
 0x60a   :  { %459 = vadd.xlane.f32.xlu1 %v458_v50  ;;  %v1062_v50 = vld [vmem:[%s4126_s9] sm:$0xff] }
 0x61b   :  { %544 = vrot.lane.b32.xlu1 %v3702_v39, %s3408_s5 }
 0x693   :  { %v460_v51 = vpop.xlane.xlu1 %459 }
 0x694   :  { %3319 = vrcp.f32 %v460_v51 }
 0x697   :  { %v545_v55 = vpop.permute.xlu1 %544 }
 0x6a1   :  { %v3320_v52 = vpop.eup %3319 }
 0x6a2   :  { %v462_v53 = vmul.f32 %v3320_v52, %v3318_v49  ;;  %v1063_v49 = vld [vmem:[%s4126_s9 + $0x8] sm:$0xff] }
 0x6a4   :  { %3107 = vmatmul.mubr.msk.f32.vlgmr.msra.gmra.mxu1 %vm465_vm7, %v462_v53 }
 0x6a5   :  { %3110 = vmatpush3.xpose.msk.msra.mxu1 %vm375_vm4, %v547_v54  ;;  %3111 = vmatprep.mubr.msk.f32.mxu1 %vm3404_vm3, %v3403_v2 }
 0x6a6   :  { %3114 = vmatprep.subr.mxu1 %v3403_v2 }
 0x6a8   :  { %3112 = vmatmul.mubr.msk.f32.vlgmr.msra.gmra.mxu1 %vm375_vm4, %v545_v55 }
 0x6a9   :  { %3116 = vmatprep.mubr.msk.f32.mxu1 %vm3404_vm3, %v3403_v2 }
 0x764   :  { %v538_v56 = vpop.f32.mrf.mxu1 }
 0x765   :  { %543 = vst.msk [vmem:[#allocation2] sm:$0x1f] %vm542_vm8, %v538_v56 }
 0x766   :  { %v3108_v57 = vpop.f32.mrf.mxu1 }
 0x767   :  { %v2909_v57 = vld [vmem:[%s4127_s10] ss:$0 sm:$0xff] }
 0x768   :  { %v618_v58 = vpop.f32.mrf.mxu1 }
 0x769   :  { %v622_v59 = vmul.f32 0.25, %v618_v58 }
 0x76a   :  { %v3113_v60 = vpop.f32.mrf.mxu1 }
 0x76b   :  { %v623_v61 = vsel %vm451_vm5, %v622_v59, -inf }
 0x76c   :  { %624 = vmax.xlane.f32.xlu0 %v623_v61 }
 0x782   :  { %634 = vrot.lane.b32.xlu0 %v3702_v39, %s3409_s24 }
 0x7f5   :  { %v625_v63 = vpop.xlane.xlu0 %624 }
 0x7f6   :  { %v626_v0 = vsub.f32 %v622_v59, %v625_v63 }
 0x7f8   :  { %v627_v1 = vmul.f32 1.442695, %v626_v0 }
 0x7f9   :  { %v635_v4 = vpop.permute.xlu0 %634 }
 0x7fa   :  { %3321 = vpow2.f32 %v627_v1  ;;  %3115 = vmatpush3.msk.msra.mxu1 %vm469_vm6, %v635_v4 }
 0x7fb   :  { %3119 = vmatprep.subr.mxu1 %v3403_v2 }
 0x807   :  { %v3322_v5 = vpop.eup %3321 }
 0x808   :  { %v629_v6 = vsel %vm451_vm5, %v3322_v5, 0.0 }
 0x809   :  { %630 = vadd.xlane.f32.xlu1 %v629_v6 }
 0x81a   :  { %722 = vrot.lane.b32.xlu1 %v3740_v9, %s3405_s29 }
 0x892   :  { %v631_v10 = vpop.xlane.xlu1 %630 }
 0x893   :  { %3323 = vrcp.f32 %v631_v10 }
 0x896   :  { %v723_v13 = vpop.permute.xlu1 %722 }
 0x8a0   :  { %v3324_v11 = vpop.eup %3323 }
 0x8a1   :  { %v633_v12 = vmul.f32 %v3324_v11, %v3322_v5 }
 0x8a3   :  { %3117 = vmatmul.mubr.msk.f32.vlgmr.msra.gmra.mxu1 %vm465_vm7, %v633_v12  ;;  %v1205_v12 = vld [vmem:[%s4130_s13 + $0x18] sm:$0xff] }
 0x8a4   :  { %3120 = vmatpush3.xpose.msk.msra.mxu1 %vm375_vm4, %v723_v13  ;;  %3121 = vmatprep.mubr.msk.f32.mxu1 %vm3404_vm3, %v3403_v2  ;;  %v1204_v13 = vld [vmem:[%s4130_s13 + $0x10] sm:$0xff] }
 0x8a5   :  { %3124 = vmatprep.subr.mxu1 %v3403_v2  ;;  %3150 = vmatprep.subr.mxu0 %v1205_v12 }
 0x8a6   :  { %3151 = vmatpush3.msra.mxu0 %v1205_v12 }
 0x8a7   :  { %3122 = vmatmul.mubr.msk.f32.vlgmr.msra.gmra.mxu1 %vm375_vm4, %v3740_v9  ;;  %3152 = vmatprep.subr.mxu0 %v1204_v13 }
 0x8a8   :  { %3126 = vmatprep.mubr.msk.f32.mxu1 %vm3404_vm3, %v3403_v2  ;;  %3153 = vmatpush3.msra.mxu0 %v1204_v13  ;;  %v2927_v13 = vld [vmem:[%s4162_s3 + $0x38] sm:$0xff] }
 0x963   :  { %v707_v14 = vpop.f32.mrf.mxu1 }
 0x965   :  { %v3118_v15 = vpop.f32.mrf.mxu1 }
 0x966   :  { %v1202_v15 = vld [vmem:[%s4130_s13] sm:$0xff] }
 0x967   :  { %v794_v16 = vpop.f32.mrf.mxu1 }
 0x968   :  { %v798_v17 = vmul.f32 0.25, %v794_v16 }
 0x969   :  { %v3123_v18 = vpop.f32.mrf.mxu1 }
 0x96a   :  { %v799_v19 = vsel %vm451_vm5, %v798_v17, -inf }
 0x96b   :  { %800 = vmax.xlane.f32.xlu0 %v799_v19 }
 0x981   :  { %810 = vrot.lane.b32.xlu0 %v3740_v9, %s4147_s30 }
 0x985   :  { %888 = vrot.lane.b32.xlu0 %v3740_v9, %s3408_s5 }
 0x9f4   :  { %v801_v20 = vpop.xlane.xlu0 %800 }
 0x9f5   :  { %v802_v21 = vsub.f32 %v798_v17, %v801_v20 }
 0x9f7   :  { %v803_v22 = vmul.f32 1.442695, %v802_v21 }
 0x9f8   :  { %v811_v23 = vpop.permute.xlu0 %810 }
 0x9f9   :  { %3325 = vpow2.f32 %v803_v22  ;;  %3125 = vmatpush3.msk.msra.mxu1 %vm469_vm6, %v811_v23  ;;  %v2910_v23 = vld [vmem:[%s4128_s11] ss:$0 sm:$0xff] }
 0x9fa   :  { %3129 = vmatprep.subr.mxu1 %v3403_v2 }
 0x9fc   :  { %v889_v30 = vpop.permute.xlu0 %888 }
 0xa06   :  { %v3326_v24 = vpop.eup %3325 }
 0xa07   :  { %v805_v25 = vsel %vm451_vm5, %v3326_v24, 0.0 }
 0xa08   :  { %806 = vadd.xlane.f32.xlu1 %v805_v25  ;;  %v2911_v25 = vld [vmem:[%s4129_s12] ss:$0 sm:$0xff] }
 0xa19   :  { %890 = vrot.lane.b32.xlu1 %v3740_v9, %s3406_s4 }
 0xa91   :  { %v807_v26 = vpop.xlane.xlu1 %806 }
 0xa92   :  { %3327 = vrcp.f32 %v807_v26 }
 0xa95   :  { %v891_v29 = vpop.permute.xlu1 %890 }
 0xa9f   :  { %v3328_v27 = vpop.eup %3327 }
 0xaa0   :  { %v809_v28 = vmul.f32 %v3328_v27, %v3326_v24 }
 0xaa2   :  { %3127 = vmatmul.mubr.msk.f32.vlgmr.msra.gmra.mxu1 %vm465_vm7, %v809_v28 }
 0xaa3   :  { %3130 = vmatpush3.xpose.msk.msra.mxu1 %vm375_vm4, %v891_v29  ;;  %3131 = vmatprep.mubr.msk.f32.mxu1 %vm3404_vm3, %v3403_v2 }
 0xaa4   :  { %3134 = vmatprep.subr.mxu1 %v3403_v2 }
 0xaa6   :  { %3132 = vmatmul.mubr.msk.f32.vlgmr.msra.gmra.mxu1 %vm375_vm4, %v889_v30 }
 0xaa7   :  { %3136 = vmatprep.mubr.msk.f32.mxu1 %vm3404_vm3, %v3403_v2 }
 0xb62   :  { %v883_v31 = vpop.f32.mrf.mxu1 }
 0xb63   :  { %887 = vst.msk [vmem:[#allocation2 + $0x5] sm:$0x1f] %vm542_vm8, %v883_v31 }
 0xb64   :  { %v3128_v32 = vpop.f32.mrf.mxu1 }
 0xb65   :  { %v1317_v32 = vld [vmem:[%s4132_s15 + $0x38] sm:$0xff] }
 0xb66   :  { %v962_v33 = vpop.f32.mrf.mxu1 }
 0xb67   :  { %v966_v34 = vmul.f32 0.25, %v962_v33  ;;  %v1316_v33 = vld [vmem:[%s4132_s15 + $0x30] sm:$0xff] }
 0xb68   :  { %v3133_v35 = vpop.f32.mrf.mxu1 }
 0xb69   :  { %v967_v36 = vsel %vm451_vm5, %v966_v34, -inf  ;;  %v1314_v35 = vld [vmem:[%s4132_s15 + $0x20] sm:$0xff] }
 0xb6a   :  { %968 = vmax.xlane.f32.xlu1 %v967_v36  ;;  %v1313_v36 = vld [vmem:[%s4132_s15 + $0x18] sm:$0xff] }
 0xb7b   :  { %712 = vrot.lane.b32.xlu1 %v707_v14, %s3410_s25  ;;  %v1203_v14 = vld [vmem:[%s4130_s13 + $0x8] sm:$0xff] }
 0xb7c   :  { %3154 = vmatprep.subr.mxu0 %v1203_v14 }
 0xb7d   :  { %3155 = vmatpush3.msra.mxu0 %v1203_v14  ;;  %v2926_v14 = vld [vmem:[%s4162_s3 + $0x30] sm:$0xff] }
 0xb7e   :  { %3156 = vmatprep.subr.mxu0 %v1202_v15 }
 0xb7f   :  { %3157 = vmatpush3.msra.mxu0 %v1202_v15  ;;  %v2925_v15 = vld [vmem:[%s4162_s3 + $0x28] sm:$0xff] }
 0xb80   :  { %3180 = vmatprep.subr.mxu0 %v2927_v13 }
 0xbf3   :  { %v969_v37 = vpop.xlane.xlu1 %968 }
 0xbf4   :  { %v970_v38 = vsub.f32 %v966_v34, %v969_v37  ;;  %v1315_v34 = vld [vmem:[%s4132_s15 + $0x28] sm:$0xff]  ;;  %v1312_v37 = vld [vmem:[%s4132_s15 + $0x10] sm:$0xff] }
 0xbf6   :  { %v971_v39 = vmul.f32 1.442695, %v970_v38  ;;  %v1311_v38 = vld [vmem:[%s4132_s15 + $0x8] sm:$0xff] }
 0xbf7   :  { %v713_v40 = vpop.permute.xlu1 %712 }
 0xbf8   :  { %3329 = vpow2.f32 %v971_v39  ;;  %716 = vst.msk [vmem:[#allocation2] sm:$0x1f] %vm715_vm10, %v713_v40  ;;  %v1310_v39 = vld [vmem:[%s4132_s15] sm:$0xff] }
 0xbf9   :  { %v2912_v40 = vld [vmem:[%s4131_s14] ss:$0 sm:$0xff] }
 0xc05   :  { %v3330_v41 = vpop.eup %3329 }
 0xc06   :  { %v973_v42 = vsel %vm451_vm5, %v3330_v41, 0.0 }
 0xc07   :  { %974 = vadd.xlane.f32.xlu0 %v973_v42 }
 0xc1d   :  { %978 = vrot.lane.b32.xlu0 %v3740_v9, %s3409_s24 }
 0xc90   :  { %v975_v43 = vpop.xlane.xlu0 %974 }
 0xc91   :  { %3331 = vrcp.f32 %v975_v43 }
 0xc94   :  { %v979_v44 = vpop.permute.xlu0 %978 }
 0xc95   :  { %3135 = vmatpush3.msk.msra.mxu1 %vm469_vm6, %v979_v44 }
 0xc96   :  { %3139 = vmatprep.subr.mxu1 %v1065_v47 }
 0xc9e   :  { %v3332_v45 = vpop.eup %3331 }
 0xc9f   :  { %v977_v46 = vmul.f32 %v3332_v45, %v3330_v41 }
 0xca1   :  { %3137 = vmatmul.mubr.msk.f32.vlgmr.msra.gmra.mxu1 %vm465_vm7, %v977_v46 }
 0xca2   :  { %3140 = vmatpush3.msra.mxu1 %v1065_v47 }
 0xca3   :  { %3141 = vmatprep.subr.mxu1 %v1064_v48 }
 0xca4   :  { %3142 = vmatpush3.msra.mxu1 %v1064_v48 }
 0xca5   :  { %3143 = vmatprep.subr.mxu1 %v1063_v49 }
 0xca6   :  { %3144 = vmatpush3.msra.mxu1 %v1063_v49 }
 0xca7   :  { %3145 = vmatprep.subr.mxu1 %v1062_v50 }
 0xca8   :  { %3146 = vmatpush3.msra.mxu1 %v1062_v50 }
 0xca9   :  { %3161 = vmatprep.subr.mxu1 %v1317_v32 }
 0xd61   :  { %v1051_v51 = vpop.f32.mrf.mxu1 }
 0xd62   :  { %1056 = vrot.lane.b32.xlu1 %v1051_v51, %s3410_s25 }
 0xd63   :  { %v3138_v52 = vpop.f32.mrf.mxu1 }
 0xdd4   :  { %v1057_v53 = vpop.permute.xlu1 %1056 }
 0xdd5   :  { %1059 = vst.msk [vmem:[#allocation2 + $0x5] sm:$0x1f] %vm715_vm10, %v1057_v53 }
 0xddc   :  { %v1060_v54 = vld [vmem:[#allocation2] sm:$0xff]  ;;  %v1061_v55 = vld [vmem:[#allocation2 + $0x8] sm:$0x3] }
 0xddd   :  { %3147 = vmatprep.mubr.msk.f32.mxu1 %vm191_vm1, %v1060_v54 }
 0xdde   :  { %3148 = vmatmul.mubr.msk.f32.vlgmr.msra.gmra.mxu1 %vm191_vm1, %v1061_v55 }
 0xddf   :  { %3162 = vmatpush3.msra.mxu1 %v1317_v32 }
 0xde0   :  { %3163 = vmatprep.subr.mxu1 %v1316_v33 }
 0xde1   :  { %3164 = vmatpush3.msra.mxu1 %v1316_v33  ;;  %v2929_v33 = vld [vmem:[%s4125_s8 + $0x1] ss:$0 sm:$0xff]  ;;  %s4165_s8 = smov 64  }
 0xde2   :  { %3165 = vmatprep.subr.mxu1 %v1315_v34 }
 0xde3   :  { %3166 = vmatpush3.msra.mxu1 %v1315_v34 }
 0xde4   :  { %3167 = vmatprep.subr.mxu1 %v1314_v35 }
 0xde5   :  { %3168 = vmatpush3.msra.mxu1 %v1314_v35 }
 0xde6   :  { %3169 = vmatprep.subr.mxu1 %v1313_v36 }
 0xde7   :  { %3170 = vmatpush3.msra.mxu1 %v1313_v36 }
 0xde8   :  { %3171 = vmatprep.subr.mxu1 %v1312_v37 }
 0xde9   :  { %3172 = vmatpush3.msra.mxu1 %v1312_v37 }
 0xdea   :  { %3173 = vmatprep.subr.mxu1 %v1311_v38 }
 0xdeb   :  { %3174 = vmatpush3.msra.mxu1 %v1311_v38 }
 0xdec   :  { %3175 = vmatprep.subr.mxu1 %v1310_v39 }
 0xded   :  { %3176 = vmatpush3.msra.mxu1 %v1310_v39 }
 0xdee   :  { %3196 = vmatprep.subr.mxu1 %v3403_v2 }
 0xe9e   :  { %v3149_v56 = vpop.f32.mrf.mxu1 }
 0xe9f   :  { %v1148_v58 = vadd.f32 %v3149_v56, %v3666_v3 }
 0xea0   :  { %v1138_v59 = vpop.f32.mrf.mxu1 }
 0xea1   :  { %v3800_v60 = vadd.f32 %v2909_v57, %v1148_v58  ;;  %v1147_v61 = vadd.f32 %v1138_v59, %v3662_v62  ;;  %v2919_v58 = vld [vmem:[%s4133_s16] ss:$0 sm:$0xff] }
 0xea3   :  { %v3803_v63 = vadd.f32 %v2909_v57, %v1147_v61  ;;  %v1163_v0 = vsel %vm195_vm2, %v3800_v60, 0.0 }
 0xea4   :  { %1164 = vadd.xlane.f32.xlu1 %v1163_v0 }
 0xea5   :  { %v1160_v1 = vsel %vm191_vm1, %v3803_v63, 0.0 }
 0xea6   :  { %1161 = vadd.xlane.f32.xlu0 %v1160_v1 }
 0xf2d   :  { %v1165_v4 = vpop.xlane.xlu1 %1164 }
 0xf2e   :  { %v1167_v5 = vmul.f32 0.03125, %v1165_v4 }
 0xf2f   :  { %v1162_v6 = vpop.xlane.xlu0 %1161 }
 0xf30   :  { %v1166_v7 = vmul.f32 0.03125, %v1162_v6  ;;  %v1169_v3 = vsub.f32 %v3800_v60, %v1167_v5 }
 0xf32   :  { %v1168_v8 = vsub.f32 %v3803_v63, %v1166_v7  ;;  %v1171_v10 = vmul.f32 %v1169_v3, %v1169_v3 }
 0xf34   :  { %v1170_v9 = vmul.f32 %v1168_v8, %v1168_v8  ;;  %v1175_v11 = vsel %vm195_vm2, %v1171_v10, 0.0 }
 0xf36   :  { %v1172_v62 = vsel %vm191_vm1, %v1170_v9, 0.0 }
 0xf37   :  { %1173 = vadd.xlane.f32.xlu0 %v1172_v62 }
 0xf3b   :  { %1176 = vadd.xlane.f32.xlu0 %v1175_v11 }
 0xfc0   :  { %v1174_v16 = vpop.xlane.xlu0 %1173 }
 0xfc1   :  { %v1178_v17 = vmul.f32 0.03125, %v1174_v16  ;;  %v2924_v16 = vld [vmem:[%s4162_s3 + $0x20] sm:$0xff] }
 0xfc3   :  { %v1180_v18 = vadd.f32 1e-05, %v1178_v17 }
 0xfc4   :  { %v1177_v19 = vpop.xlane.xlu0 %1176 }
 0xfc5   :  { %3333 = vrsqrt.f32 %v1180_v18  ;;  %v1179_v20 = vmul.f32 0.03125, %v1177_v19 }
 0xfc7   :  { %v1181_v21 = vadd.f32 1e-05, %v1179_v20 }
 0xfc9   :  { %3335 = vrsqrt.f32 %v1181_v21 }
 0xfd2   :  { %v3334_v22 = vpop.eup %3333 }
 0xfd3   :  { %v1184_v24 = vmul.f32 %v3334_v22, %v1168_v8 }
 0xfd5   :  { %v1192_v26 = vmul.f32 %v2910_v23, %v1184_v24  ;;  %v2922_v24 = vld [vmem:[%s4163_s2 + $0x1] ss:$0 sm:$0xff] }
 0xfd6   :  { %v3336_v27 = vpop.eup %3335 }
 0xfd7   :  { %v1185_v28 = vmul.f32 %v3336_v27, %v1169_v3  ;;  %v1200_v29 = vadd.f32 %v2911_v25, %v1192_v26 }
 0xfd9   :  { %v1193_v30 = vmul.f32 %v2910_v23, %v1185_v28  ;;  %3158 = vmatprep.mubr.msk.f32.mxu0 %vm191_vm1, %v1200_v29  ;;  %v2923_v29 = vld [vmem:[%s4164_s27 + $0x1] ss:$0 sm:$0xff] }
 0xfdb   :  { %v1201_v31 = vadd.f32 %v2911_v25, %v1193_v30 }
 0xfdd   :  { %3159 = vmatmul.mubr.msk.f32.vlgmr.msra.gmra.mxu0 %vm191_vm1, %v1201_v31 }
 0xfde   :  { %3181 = vmatpush3.msra.mxu0 %v2927_v13 }
 0xfdf   :  { %3182 = vmatprep.subr.mxu0 %v2926_v14 }
 0xfe0   :  { %3183 = vmatpush3.msra.mxu0 %v2926_v14 }
 0xfe1   :  { %3184 = vmatprep.subr.mxu0 %v2925_v15 }
 0xfe2   :  { %3185 = vmatpush3.msra.mxu0 %v2925_v15 }
 0xfe3   :  { %3186 = vmatprep.subr.mxu0 %v2924_v16 }
 0xfe4   :  { %3187 = vmatpush3.msra.mxu0 %v2924_v16 }
 0xfe5   :  { %3191 = vmatprep.subr.mxu0 %v3403_v2 }
0x109d   :  { %v3160_v41 = vpop.f32.mrf.mxu0 }
0x109e   :  { %v1291_v42 = vadd.f32 %v3160_v41, %v2912_v40 }
0x109f   :  { %v1285_v43 = vpop.f32.mrf.mxu0 }
0x10a0   :  { %v2916_v44 = vmul.f32 -1.702, %v1291_v42  ;;  %v1286_v45 = vadd.f32 %v2912_v40, %v1285_v43 }
0x10a2   :  { %v1300_v46 = vmul.f32 1.442695, %v2916_v44  ;;  %v2915_v47 = vmul.f32 -1.702, %v1286_v45 }
0x10a4   :  { %3337 = vpow2.f32 %v1300_v46  ;;  %v1298_v48 = vmul.f32 1.442695, %v2915_v47 }
0x10a6   :  { %3339 = vpow2.f32 %v1298_v48 }
0x10b1   :  { %v3338_v49 = vpop.eup %3337 }
0x10b2   :  { %v1303_v50 = vadd.f32 1.0, %v3338_v49 }
0x10b3   :  { %v3340_v51 = vpop.eup %3339 }
0x10b4   :  { %v1302_v52 = vadd.f32 1.0, %v3340_v51  ;;  %3341 = vrcp.f32 %v1303_v50 }
0x10b6   :  { %3343 = vrcp.f32 %v1302_v52 }
0x10c1   :  { %v3342_v53 = vpop.eup %3341 }
0x10c2   :  { %v1309_v56 = vmul.f32 %v3342_v53, %v1291_v42 }
0x10c3   :  { %v3344_v54 = vpop.eup %3343 }
0x10c4   :  { %v1308_v55 = vmul.f32 %v3344_v54, %v1286_v45 }
0x10c6   :  { %3177 = vmatprep.mubr.msk.f32.mxu1 %vm107_vm0, %v1308_v55 }
0x10c7   :  { %3178 = vmatmul.mubr.msk.f32.vlgmr.msra.gmra.mxu1 %vm107_vm0, %v1309_v56 }
0x10c8   :  { %3198 = vmatprep.mubr.msk.f32.mxu1 %vm3404_vm3, %v3403_v2 }
0x1187   :  { %v3179_v57 = vpop.f32.mrf.mxu1 }
0x1188   :  { %v1400_v59 = vadd.f32 %v3179_v57, %v3800_v60 }
0x1189   :  { %v1390_v61 = vpop.f32.mrf.mxu1 }
0x118a   :  { %v3869_v0 = vadd.f32 %v2919_v58, %v1400_v59  ;;  %v1399_v1 = vadd.f32 %v1390_v61, %v3803_v63 }
0x118c   :  { %v3872_v4 = vadd.f32 %v2919_v58, %v1399_v1  ;;  %v1417_v5 = vsel %vm195_vm2, %v3869_v0, 0.0 }
0x118d   :  { %1418 = vadd.xlane.f32.xlu1 %v1417_v5 }
0x118e   :  { %v1414_v6 = vsel %vm191_vm1, %v3872_v4, 0.0 }
0x118f   :  { %1415 = vadd.xlane.f32.xlu0 %v1414_v6 }
0x1216   :  { %v1419_v7 = vpop.xlane.xlu1 %1418 }
0x1217   :  { %v1421_v3 = vmul.f32 0.03125, %v1419_v7 }
0x1218   :  { %v1416_v8 = vpop.xlane.xlu0 %1415 }
0x1219   :  { %v1423_v60 = vsub.f32 %v3869_v0, %v1421_v3  ;;  %v1420_v9 = vmul.f32 0.03125, %v1416_v8 }
0x121b   :  { %v1422_v62 = vsub.f32 %v3872_v4, %v1420_v9  ;;  %v1425_v10 = vmul.f32 %v1423_v60, %v1423_v60 }
0x121d   :  { %v1429_v63 = vsel %vm195_vm2, %v1425_v10, 0.0  ;;  %v1424_v11 = vmul.f32 %v1422_v62, %v1422_v62 }
0x121e   :  { %1430 = vadd.xlane.f32.xlu1 %v1429_v63 }
0x121f   :  { %v1426_v12 = vsel %vm191_vm1, %v1424_v11, 0.0 }
0x1220   :  { %1427 = vadd.xlane.f32.xlu0 %v1426_v12 }
0x12a7   :  { %v1431_v17 = vpop.xlane.xlu1 %1430 }
0x12a8   :  { %v1433_v18 = vmul.f32 0.03125, %v1431_v17 }
0x12a9   :  { %v1428_v19 = vpop.xlane.xlu0 %1427 }
0x12aa   :  { %v1435_v20 = vadd.f32 1e-05, %v1433_v18  ;;  %v1432_v21 = vmul.f32 0.03125, %v1428_v19 }
0x12ac   :  { %3345 = vrsqrt.f32 %v1435_v20  ;;  %v1434_v22 = vadd.f32 1e-05, %v1432_v21 }
0x12ae   :  { %3347 = vrsqrt.f32 %v1434_v22 }
0x12b9   :  { %v3346_v23 = vpop.eup %3345 }
0x12ba   :  { %v1439_v25 = vmul.f32 %v3346_v23, %v1423_v60 }
0x12bb   :  { %v3348_v26 = vpop.eup %3347 }
0x12bc   :  { %v1438_v27 = vmul.f32 %v3348_v26, %v1422_v62  ;;  %v1447_v28 = vmul.f32 %v2922_v24, %v1439_v25 }
0x12be   :  { %v1446_v30 = vmul.f32 %v2922_v24, %v1438_v27  ;;  %v1455_v32 = vadd.f32 %v2923_v29, %v1447_v28 }
0x12c0   :  { %v1454_v31 = vadd.f32 %v2923_v29, %v1446_v30 }
0x12c2   :  { %3188 = vmatprep.mubr.msk.f32.mxu0 %vm191_vm1, %v1454_v31 }
0x12c3   :  { %3189 = vmatmul.mubr.msk.f32.vlgmr.msra.gmra.mxu0 %vm191_vm1, %v1455_v32 }
0x12c4   :  { %3193 = vmatprep.mubr.msk.f32.mxu0 %vm3404_vm3, %v3403_v2 }
0x1383   :  { %v3190_v34 = vpop.f32.mrf.mxu0 }
0x1384   :  { %v1547_v35 = vadd.f32 %v3190_v34, %v2929_v33 }
0x1385   :  { %v1541_v36 = vpop.f32.mrf.mxu0 }
0x1386   :  { %v3908_v37 = vadd.f32 %v2929_v33, %v1541_v36  ;;  %v1891_v38 = vrot.slane %v1547_v35, 5 }
0x1388   :  { %1719 = vrot.lane.b32.xlu1 %v3908_v37, %s3406_s4  ;;  %1551 = vrot.lane.b32.xlu0 %v3908_v37, %s3405_s29  ;;  %v1890_v39 = vrot.slane %v3908_v37, 5 }
0x138a   :  { %v3916_v40 = vsel %vm718_vm9, %v1890_v39, %v1891_v38 }
0x138c   :  { %1717 = vrot.lane.b32.xlu1 %v3908_v37, %s3408_s5  ;;  %2061 = vrot.lane.b32.xlu0 %v3916_v40, %s3406_s4 }
0x1390   :  { %1893 = vrot.lane.b32.xlu1 %v3916_v40, %s3405_s29 }
0x1394   :  { %2059 = vrot.lane.b32.xlu1 %v3916_v40, %s3408_s5 }
0x13fa   :  { %v1720_v41 = vpop.permute.xlu1 %1719  ;;  %v1552_v42 = vpop.permute.xlu0 %1551 }
0x13fb   :  { %3192 = vmatpush3.xpose.msk.msra.mxu0 %vm375_vm4, %v1552_v42 }
0x13fc   :  { %3201 = vmatprep.subr.mxu0 %v3403_v2 }
0x13fe   :  { %v1718_v43 = vpop.permute.xlu1 %1717  ;;  %3194 = vmatmul.mubr.msk.f32.vlgmr.msra.gmra.mxu0 %vm375_vm4, %v3908_v37  ;;  %v2062_v45 = vpop.permute.xlu0 %2061 }
0x13ff   :  { %3202 = vmatpush3.xpose.msk.msra.mxu0 %vm375_vm4, %v1720_v41  ;;  %3203 = vmatprep.mubr.msk.f32.mxu0 %vm3404_vm3, %v3403_v2 }
0x1400   :  { %3211 = vmatprep.subr.mxu0 %v3403_v2 }
0x1402   :  { %3204 = vmatmul.mubr.msk.f32.vlgmr.msra.gmra.mxu0 %vm375_vm4, %v1718_v43  ;;  %v1894_v44 = vpop.permute.xlu1 %1893 }
0x1403   :  { %3212 = vmatpush3.xpose.msk.msra.mxu0 %vm375_vm4, %v1894_v44  ;;  %3213 = vmatprep.mubr.msk.f32.mxu0 %vm3404_vm3, %v3403_v2  ;;  %v2951_v44 = vld [vmem:[%s4126_s9 + $0x38] sm:$0xff] }
0x1404   :  { %3221 = vmatprep.subr.mxu0 %v3403_v2 }
0x1406   :  { %3214 = vmatmul.mubr.msk.f32.vlgmr.msra.gmra.mxu0 %vm375_vm4, %v3916_v40  ;;  %v2060_v46 = vpop.permute.xlu1 %2059 }
0x1407   :  { %3222 = vmatpush3.xpose.msk.msra.mxu0 %vm375_vm4, %v2062_v45  ;;  %3223 = vmatprep.mubr.msk.f32.mxu0 %vm3404_vm3, %v3403_v2  ;;  %v2950_v45 = vld [vmem:[%s4126_s9 + $0x30] sm:$0xff] }
0x1408   :  { %3231 = vmatprep.subr.mxu0 %v2951_v44 }
0x140a   :  { %3224 = vmatmul.mubr.msk.f32.vlgmr.msra.gmra.mxu0 %vm375_vm4, %v2060_v46  ;;  %v2949_v46 = vld [vmem:[%s4126_s9 + $0x28] sm:$0xff] }
0x140b   :  { %3232 = vmatpush3.msra.mxu0 %v2951_v44 }
0x140c   :  { %3233 = vmatprep.subr.mxu0 %v2950_v45 }
0x140d   :  { %3234 = vmatpush3.msra.mxu0 %v2950_v45 }
0x140e   :  { %3235 = vmatprep.subr.mxu0 %v2949_v46 }
0x140f   :  { %3236 = vmatpush3.msra.mxu0 %v2949_v46 }
0x14be   :  { %v1623_v47 = vpop.f32.mrf.mxu0 }
0x14bf   :  { %v1627_v48 = vmul.f32 0.25, %v1623_v47  ;;  %v2948_v47 = vld [vmem:[%s4126_s9 + $0x20] sm:$0xff] }
0x14c0   :  { %v3195_v49 = vpop.f32.mrf.mxu0  ;;  %3237 = vmatprep.subr.mxu0 %v2948_v47 }
0x14c1   :  { %v1628_v50 = vsel %vm451_vm5, %v1627_v48, -inf  ;;  %3238 = vmatpush3.msra.mxu0 %v2948_v47 }
0x14c2   :  { %v1791_v51 = vpop.f32.mrf.mxu0  ;;  %1629 = vmax.xlane.f32.xlu0 %v1628_v50 }
0x14c3   :  { %v1795_v52 = vmul.f32 0.25, %v1791_v51 }
0x14c4   :  { %v3205_v53 = vpop.f32.mrf.mxu0 }
0x14c5   :  { %v1796_v54 = vsel %vm451_vm5, %v1795_v52, -inf }
0x14c6   :  { %1797 = vmax.xlane.f32.xlu1 %v1796_v54  ;;  %v1965_v55 = vpop.f32.mrf.mxu0 }
0x14c7   :  { %v1969_v56 = vmul.f32 0.25, %v1965_v55  ;;  %v2955_v55 = vld [vmem:[%s4127_s10 + $0x1] ss:$0 sm:$0xff] }
0x14c8   :  { %v3215_v57 = vpop.f32.mrf.mxu0 }
0x14c9   :  { %v1970_v58 = vsel %vm451_vm5, %v1969_v56, -inf }
0x14ca   :  { %1971 = vmax.xlane.f32.xlu0 %v1970_v58  ;;  %v2133_v59 = vpop.f32.mrf.mxu0 }
0x14cb   :  { %v2137_v61 = vmul.f32 0.25, %v2133_v59 }
0x14cc   :  { %v3225_v1 = vpop.f32.mrf.mxu0 }
0x14cd   :  { %v2138_v5 = vsel %vm451_vm5, %v2137_v61, -inf }
0x14ce   :  { %2139 = vmax.xlane.f32.xlu0 %v2138_v5 }
0x154b   :  { %v1630_v6 = vpop.xlane.xlu0 %1629 }
0x154c   :  { %v1631_v7 = vsub.f32 %v1627_v48, %v1630_v6 }
0x154e   :  { %v1632_v3 = vmul.f32 1.442695, %v1631_v7 }
0x154f   :  { %v1798_v8 = vpop.xlane.xlu1 %1797 }
0x1550   :  { %3349 = vpow2.f32 %v1632_v3  ;;  %v1799_v60 = vsub.f32 %v1795_v52, %v1798_v8 }
0x1552   :  { %v1800_v9 = vmul.f32 1.442695, %v1799_v60 }
0x1553   :  { %v1972_v62 = vpop.xlane.xlu0 %1971 }
0x1554   :  { %3351 = vpow2.f32 %v1800_v9  ;;  %v1973_v10 = vsub.f32 %v1969_v56, %v1972_v62 }
0x1556   :  { %v1974_v63 = vmul.f32 1.442695, %v1973_v10 }
0x1557   :  { %v2140_v17 = vpop.xlane.xlu0 %2139 }
0x1558   :  { %3353 = vpow2.f32 %v1974_v63  ;;  %v2141_v18 = vsub.f32 %v2137_v61, %v2140_v17  ;;  %v2963_v63 = vld [vmem:[%s4130_s13 + $0x38] sm:$0xff] }
0x155a   :  { %v2142_v19 = vmul.f32 1.442695, %v2141_v18 }
0x155c   :  { %3355 = vpow2.f32 %v2142_v19 }
0x155d   :  { %v3350_v11 = vpop.eup %3349 }
0x155e   :  { %v1634_v12 = vsel %vm451_vm5, %v3350_v11, 0.0 }
0x155f   :  { %1635 = vadd.xlane.f32.xlu0 %v1634_v12  ;;  %v2961_v12 = vld [vmem:[%s4130_s13 + $0x28] sm:$0xff] }
0x1561   :  { %v3352_v13 = vpop.eup %3351 }
0x1562   :  { %v1802_v14 = vsel %vm451_vm5, %v3352_v13, 0.0 }
0x1563   :  { %1803 = vadd.xlane.f32.xlu1 %v1802_v14 }
0x1565   :  { %v3354_v15 = vpop.eup %3353 }
0x1566   :  { %v1976_v16 = vsel %vm451_vm5, %v3354_v15, 0.0 }
0x1567   :  { %1977 = vadd.xlane.f32.xlu0 %v1976_v16 }
0x1569   :  { %v3356_v20 = vpop.eup %3355 }
0x156a   :  { %v2144_v21 = vsel %vm451_vm5, %v3356_v20, 0.0 }
0x1574   :  { %1807 = vrot.lane.b32.xlu1 %v3908_v37, %s3409_s24 }
0x1578   :  { %1981 = vrot.lane.b32.xlu1 %v3916_v40, %s4165_s8 }
0x157d   :  { %1639 = vrot.lane.b32.xlu0 %v3908_v37, %s4165_s8 }
0x159c   :  { %2145 = vadd.xlane.f32.xlu1 %v2144_v21  ;;  %v2958_v21 = vld [vmem:[%s4128_s11 + $0x1] ss:$0 sm:$0xff] }
0x15ad   :  { %2149 = vrot.lane.b32.xlu1 %v3916_v40, %s3409_s24 }
0x15e8   :  { %v1636_v22 = vpop.xlane.xlu0 %1635 }
0x15e9   :  { %3357 = vrcp.f32 %v1636_v22 }
0x15ec   :  { %v1804_v23 = vpop.xlane.xlu1 %1803 }
0x15ed   :  { %3359 = vrcp.f32 %v1804_v23  ;;  %v2959_v23 = vld [vmem:[%s4129_s12 + $0x1] ss:$0 sm:$0xff] }
0x15f0   :  { %v1978_v24 = vpop.xlane.xlu0 %1977  ;;  %v1808_v27 = vpop.permute.xlu1 %1807 }
0x15f1   :  { %3361 = vrcp.f32 %v1978_v24 }
0x15f4   :  { %v1640_v25 = vpop.permute.xlu0 %1639  ;;  %v1982_v31 = vpop.permute.xlu1 %1981 }
0x15f5   :  { %3197 = vmatpush3.msk.msra.mxu1 %vm469_vm6, %v1640_v25 }
0x15f6   :  { %v3358_v26 = vpop.eup %3357  ;;  %3206 = vmatprep.subr.mxu1 %v3403_v2 }
0x15f7   :  { %v1638_v28 = vmul.f32 %v3358_v26, %v3350_v11  ;;  %v2962_v11 = vld [vmem:[%s4130_s13 + $0x30] sm:$0xff] }
0x15f9   :  { %3199 = vmatmul.mubr.msk.f32.vlgmr.msra.gmra.mxu1 %vm465_vm7, %v1638_v28 }
0x15fa   :  { %v3360_v29 = vpop.eup %3359  ;;  %3207 = vmatpush3.msk.msra.mxu1 %vm469_vm6, %v1808_v27  ;;  %3208 = vmatprep.mubr.msk.f32.mxu1 %vm3404_vm3, %v3403_v2 }
0x15fb   :  { %3216 = vmatprep.subr.mxu1 %v3403_v2  ;;  %v1806_v30 = vmul.f32 %v3360_v29, %v3352_v13  ;;  %v2960_v13 = vld [vmem:[%s4130_s13 + $0x20] sm:$0xff] }
0x15fd   :  { %3209 = vmatmul.mubr.msk.f32.vlgmr.msra.gmra.mxu1 %vm465_vm7, %v1806_v30  ;;  %v2977_v30 = vld [vmem:[%s4132_s15 + $0x78] sm:$0xff] }
0x15fe   :  { %v3362_v32 = vpop.eup %3361  ;;  %3217 = vmatpush3.msk.msra.mxu1 %vm469_vm6, %v1982_v31  ;;  %3218 = vmatprep.mubr.msk.f32.mxu1 %vm3404_vm3, %v3403_v2  ;;  %v2976_v31 = vld [vmem:[%s4132_s15 + $0x70] sm:$0xff] }
0x15ff   :  { %v1980_v33 = vmul.f32 %v3362_v32, %v3354_v15  ;;  %3226 = vmatprep.subr.mxu1 %v3403_v2  ;;  %3253 = vmatprep.subr.mxu0 %v2977_v30  ;;  %v2975_v32 = vld [vmem:[%s4132_s15 + $0x68] sm:$0xff] }
0x1601   :  { %3219 = vmatmul.mubr.msk.f32.vlgmr.msra.gmra.mxu1 %vm465_vm7, %v1980_v33  ;;  %v2974_v33 = vld [vmem:[%s4132_s15 + $0x60] sm:$0xff] }
0x1602   :  { %3228 = vmatprep.mubr.msk.f32.mxu1 %vm3404_vm3, %v3403_v2 }
0x1625   :  { %v2146_v34 = vpop.xlane.xlu1 %2145 }
0x1626   :  { %3363 = vrcp.f32 %v2146_v34  ;;  %v2973_v34 = vld [vmem:[%s4132_s15 + $0x58] sm:$0xff] }
0x1629   :  { %v2150_v35 = vpop.permute.xlu1 %2149 }
0x162a   :  { %3227 = vmatpush3.msk.msra.mxu1 %vm469_vm6, %v2150_v35  ;;  %v2972_v35 = vld [vmem:[%s4132_s15 + $0x50] sm:$0xff] }
0x162b   :  { %3242 = vmatprep.subr.mxu1 %v2963_v63 }
0x1633   :  { %v3364_v36 = vpop.eup %3363 }
0x1634   :  { %v2148_v37 = vmul.f32 %v3364_v36, %v3356_v20  ;;  %v2971_v36 = vld [vmem:[%s4132_s15 + $0x48] sm:$0xff] }
0x1636   :  { %3229 = vmatmul.mubr.msk.f32.vlgmr.msra.gmra.mxu1 %vm465_vm7, %v2148_v37  ;;  %v2970_v37 = vld [vmem:[%s4132_s15 + $0x40] sm:$0xff] }
0x1637   :  { %3243 = vmatpush3.msra.mxu1 %v2963_v63  ;;  %v2698_v63 = vld [vmem:[%s4136_s19 + $0x8] sm:$0xff] }
0x1638   :  { %3244 = vmatprep.subr.mxu1 %v2962_v11 }
0x1639   :  { %3245 = vmatpush3.msra.mxu1 %v2962_v11  ;;  %v2697_v11 = vld [vmem:[%s4136_s19] sm:$0xff] }
0x163a   :  { %3246 = vmatprep.subr.mxu1 %v2961_v12 }
0x163b   :  { %3247 = vmatpush3.msra.mxu1 %v2961_v12 }
0x163c   :  { %3248 = vmatprep.subr.mxu1 %v2960_v13 }
0x163d   :  { %3249 = vmatpush3.msra.mxu1 %v2960_v13 }
0x163e   :  { %3272 = vmatprep.subr.mxu1 %v3403_v2 }
0x16b9   :  { %v1712_v38 = vpop.f32.mrf.mxu1 }
0x16ba   :  { %1716 = vst.msk [vmem:[#allocation2] sm:$0x1f] %vm542_vm8, %v1712_v38  ;;  %v2965_v38 = vld [vmem:[%s4131_s14 + $0x1] ss:$0 sm:$0xff] }
0x16bb   :  { %v3200_v39 = vpop.f32.mrf.mxu1 }
0x16bd   :  { %v1880_v40 = vpop.f32.mrf.mxu1 }
0x16be   :  { %1885 = vrot.lane.b32.xlu0 %v1880_v40, %s3410_s25 }
0x16bf   :  { %v3210_v41 = vpop.f32.mrf.mxu1 }
0x16c1   :  { %v2054_v42 = vpop.f32.mrf.mxu1 }
0x16c2   :  { %2058 = vst.msk [vmem:[#allocation2 + $0x5] sm:$0x1f] %vm542_vm8, %v2054_v42 }
0x16c3   :  { %v3220_v43 = vpop.f32.mrf.mxu1 }
0x16f6   :  { %v2222_v48 = vpop.f32.mrf.mxu1 }
0x16f7   :  { %2227 = vrot.lane.b32.xlu1 %v2222_v48, %s3410_s25 }
0x16f8   :  { %v3230_v49 = vpop.f32.mrf.mxu1 }
0x1730   :  { %v1886_v50 = vpop.permute.xlu0 %1885 }
0x1731   :  { %1888 = vst.msk [vmem:[#allocation2] sm:$0x1f] %vm715_vm10, %v1886_v50 }
0x1769   :  { %v2228_v51 = vpop.permute.xlu1 %2227 }
0x176a   :  { %2230 = vst.msk [vmem:[#allocation2 + $0x5] sm:$0x1f] %vm715_vm10, %v2228_v51 }
0x1771   :  { %v2231_v52 = vld [vmem:[#allocation2] sm:$0xff]  ;;  %v2232_v53 = vld [vmem:[#allocation2 + $0x8] sm:$0x3] }
0x1772   :  { %3239 = vmatprep.mubr.msk.f32.mxu0 %vm191_vm1, %v2231_v52 }
0x1773   :  { %3240 = vmatmul.mubr.msk.f32.vlgmr.msra.gmra.mxu0 %vm191_vm1, %v2232_v53 }
0x1774   :  { %3254 = vmatpush3.msra.mxu0 %v2977_v30 }
0x1775   :  { %3255 = vmatprep.subr.mxu0 %v2976_v31 }
0x1776   :  { %3256 = vmatpush3.msra.mxu0 %v2976_v31 }
0x1777   :  { %3257 = vmatprep.subr.mxu0 %v2975_v32 }
0x1778   :  { %3258 = vmatpush3.msra.mxu0 %v2975_v32 }
0x1779   :  { %3259 = vmatprep.subr.mxu0 %v2974_v33 }
0x177a   :  { %3260 = vmatpush3.msra.mxu0 %v2974_v33 }
0x177b   :  { %3261 = vmatprep.subr.mxu0 %v2973_v34 }
0x177c   :  { %3262 = vmatpush3.msra.mxu0 %v2973_v34 }
0x177d   :  { %3263 = vmatprep.subr.mxu0 %v2972_v35 }
0x177e   :  { %3264 = vmatpush3.msra.mxu0 %v2972_v35 }
0x177f   :  { %3265 = vmatprep.subr.mxu0 %v2971_v36 }
0x1780   :  { %3266 = vmatpush3.msra.mxu0 %v2971_v36 }
0x1781   :  { %3267 = vmatprep.subr.mxu0 %v2970_v37 }
0x1782   :  { %3268 = vmatpush3.msra.mxu0 %v2970_v37 }
0x1833   :  { %v3241_v54 = vpop.f32.mrf.mxu0 }
0x1834   :  { %v2320_v56 = vadd.f32 %v3241_v54, %v3869_v0 }
0x1835   :  { %v2310_v57 = vpop.f32.mrf.mxu0 }
0x1836   :  { %v4002_v58 = vadd.f32 %v2955_v55, %v2320_v56  ;;  %v2319_v59 = vadd.f32 %v2310_v57, %v3872_v4  ;;  %v2981_v56 = vld [vmem:[%s4133_s16 + $0x1] ss:$0 sm:$0xff] }
0x1838   :  { %v4005_v61 = vadd.f32 %v2955_v55, %v2319_v59  ;;  %v2338_v1 = vsel %vm195_vm2, %v4002_v58, 0.0 }
0x1839   :  { %2339 = vadd.xlane.f32.xlu1 %v2338_v1 }
0x183a   :  { %v2335_v5 = vsel %vm191_vm1, %v4005_v61, 0.0 }
0x183b   :  { %2336 = vadd.xlane.f32.xlu0 %v2335_v5 }
0x18c2   :  { %v2340_v6 = vpop.xlane.xlu1 %2339 }
0x18c3   :  { %v2342_v7 = vmul.f32 0.03125, %v2340_v6 }
0x18c4   :  { %v2337_v3 = vpop.xlane.xlu0 %2336 }
0x18c5   :  { %v2341_v8 = vmul.f32 0.03125, %v2337_v3  ;;  %v2344_v0 = vsub.f32 %v4002_v58, %v2342_v7  ;;  %v2589_v7 = vld [vmem:[%s4137_s20] sm:$0x3] }
0x18c7   :  { %v2343_v60 = vsub.f32 %v4005_v61, %v2341_v8  ;;  %v2346_v62 = vmul.f32 %v2344_v0, %v2344_v0 }
0x18c9   :  { %v2345_v9 = vmul.f32 %v2343_v60, %v2343_v60  ;;  %v2350_v10 = vsel %vm195_vm2, %v2346_v62, 0.0  ;;  %v2700_v62 = vld [vmem:[%s4136_s19 + $0x18] sm:$0xff] }
0x18cb   :  { %v2347_v4 = vsel %vm191_vm1, %v2345_v9, 0.0 }
0x18cc   :  { %2348 = vadd.xlane.f32.xlu0 %v2347_v4 }
0x18d0   :  { %2351 = vadd.xlane.f32.xlu0 %v2350_v10  ;;  %v2699_v10 = vld [vmem:[%s4136_s19 + $0x10] sm:$0xff] }
0x1955   :  { %v2349_v14 = vpop.xlane.xlu0 %2348 }
0x1956   :  { %v2353_v15 = vmul.f32 0.03125, %v2349_v14 }
0x1958   :  { %v2355_v16 = vadd.f32 1e-05, %v2353_v15 }
0x1959   :  { %v2352_v17 = vpop.xlane.xlu0 %2351 }
0x195a   :  { %3365 = vrsqrt.f32 %v2355_v16  ;;  %v2354_v18 = vmul.f32 0.03125, %v2352_v17  ;;  %v2984_v16 = vld [vmem:[%s4134_s17] ss:$0 sm:$0xff] }
0x195c   :  { %v2356_v19 = vadd.f32 1e-05, %v2354_v18  ;;  %v2985_v18 = vld [vmem:[%s4135_s18] ss:$0 sm:$0xff]  ;;  %s3412_s18 = smov [#allocation4]  }
0x195d   :  { %s2874_s10 = sshll.u32 %s3412_s18, 4  ;;  %s2875_s10 = int_to_ptr.vmem [resolvable:$true] %s2874_s10 }
0x195e   :  { %3367 = vrsqrt.f32 %v2356_v19  ;;  %p3386_p1 = scmp.lt.s32.totalorder %s2875_s10, %s2875_s10 }
0x1967   :  { %v3366_v20 = vpop.eup %3365 }
0x1968   :  { %v2359_v22 = vmul.f32 %v3366_v20, %v2343_v60 }
0x196a   :  { %v2367_v24 = vmul.f32 %v2958_v21, %v2359_v22 }
0x196b   :  { %v3368_v25 = vpop.eup %3367 }
0x196c   :  { %v2360_v26 = vmul.f32 %v3368_v25, %v2344_v0  ;;  %v2375_v27 = vadd.f32 %v2959_v23, %v2367_v24  ;;  %v2783_v25 = vld [vmem:[%s4138_s21 + $0x8] sm:$0xff] }
0x196e   :  { %v2368_v28 = vmul.f32 %v2958_v21, %v2360_v26  ;;  %3250 = vmatprep.mubr.msk.f32.mxu1 %vm191_vm1, %v2375_v27  ;;  %v2782_v26 = vld [vmem:[%s4138_s21] sm:$0xff]  ;;  %v2988_v27 = vld [vmem:[#allocation3] ss:$0 sm:$0xff]  ;;  %s3381_s21 = scalar_lea.vmem %s2875_s10, 32 }
0x196f   :  { %p3382_p0 = scmp.ne.s32.totalorder %s2875_s10, %s3381_s21  ;;  %p3387_p2 = scmp.lt.s32.totalorder %s3381_s21, %s3381_s21 }
0x1970   :  { %v2376_v29 = vadd.f32 %v2959_v23, %v2368_v28  ;;  %v3411_v28 = vmov 0  }
0x1971   :  { %3307 = vset.pattern.permute.xlu1 %v3411_v28  ;;  %3308 = vset.pattern.permute.xlu0 %v3411_v28  ;;  %p3388_p3 = por %p3387_p2, %p3386_p1 }
0x1972   :  { %3251 = vmatmul.mubr.msk.f32.vlgmr.msra.gmra.mxu1 %vm191_vm1, %v2376_v29 }
0x1973   :  { %3276 = vmatprep.mubr.msk.f32.mxu1 %vm3404_vm3, %v3403_v2  ;;  %p3389_p4 = pnand %p3388_p3, %p3382_p0 }
0x1a32   :  { %v3252_v39 = vpop.f32.mrf.mxu1 }
0x1a33   :  { %v2468_v40 = vadd.f32 %v3252_v39, %v2965_v38 }
0x1a34   :  { %v2462_v41 = vpop.f32.mrf.mxu1 }
0x1a35   :  { %v2969_v42 = vmul.f32 -1.702, %v2468_v40  ;;  %v2463_v43 = vadd.f32 %v2965_v38, %v2462_v41 }
0x1a37   :  { %v2477_v44 = vmul.f32 1.442695, %v2969_v42  ;;  %v2968_v45 = vmul.f32 -1.702, %v2463_v43 }
0x1a39   :  { %3369 = vpow2.f32 %v2477_v44  ;;  %v2475_v46 = vmul.f32 1.442695, %v2968_v45 }
0x1a3b   :  { %3371 = vpow2.f32 %v2475_v46 }
0x1a46   :  { %v3370_v47 = vpop.eup %3369 }
0x1a47   :  { %v2480_v48 = vadd.f32 1.0, %v3370_v47 }
0x1a48   :  { %v3372_v49 = vpop.eup %3371 }
0x1a49   :  { %v2479_v50 = vadd.f32 1.0, %v3372_v49  ;;  %3373 = vrcp.f32 %v2480_v48 }
0x1a4b   :  { %3375 = vrcp.f32 %v2479_v50 }
0x1a56   :  { %v3374_v51 = vpop.eup %3373 }
0x1a57   :  { %v2486_v54 = vmul.f32 %v3374_v51, %v2468_v40 }
0x1a58   :  { %v3376_v52 = vpop.eup %3375 }
0x1a59   :  { %v2485_v53 = vmul.f32 %v3376_v52, %v2463_v43 }
0x1a5b   :  { %3269 = vmatprep.mubr.msk.f32.mxu0 %vm107_vm0, %v2485_v53 }
0x1a5c   :  { %3270 = vmatmul.mubr.msk.f32.vlgmr.msra.gmra.mxu0 %vm107_vm0, %v2486_v54 }
0x1b1c   :  { %v3271_v55 = vpop.f32.mrf.mxu0 }
0x1b1d   :  { %v2578_v57 = vadd.f32 %v3271_v55, %v4002_v58 }
0x1b1e   :  { %v2568_v59 = vpop.f32.mrf.mxu0 }
0x1b1f   :  { %v2588_v1 = vadd.f32 %v2981_v56, %v2578_v57  ;;  %v2577_v5 = vadd.f32 %v2568_v59, %v4005_v61 }
0x1b21   :  { %v2587_v6 = vadd.f32 %v2981_v56, %v2577_v5  ;;  %3273 = vmatpush3.msk.msra.mxu1 %vm2594_vm11, %v2588_v1 }
0x1b22   :  { %3274 = vmatprep.subr.mxu1 %v3403_v2 }
0x1b23   :  { %3275 = vmatpush3.msra.mxu1 %v2587_v6 }
0x1b24   :  { %3277 = vmatmul.mubr.msk.f32.vlgmr.msra.gmra.mxu1 %vm2590_vm12, %v2589_v7  ;;  %3279 = vmatprep.subr.mxu1 %v3403_v2 }
0x1b25   :  { %3287 = vmatprep.mubr.msk.f32.mxu1 %vm3404_vm3, %v3403_v2  ;;  %3280 = vmatpush3.msra.mxu1 %v2700_v62 }
0x1b26   :  { %3281 = vmatprep.subr.mxu1 %v3403_v2 }
0x1b27   :  { %3282 = vmatpush3.msra.mxu1 %v2699_v10 }
0x1b28   :  { %3283 = vmatprep.subr.mxu1 %v3403_v2 }
0x1b29   :  { %3284 = vmatpush3.msra.mxu1 %v2698_v63 }
0x1b2a   :  { %3285 = vmatprep.subr.mxu1 %v3403_v2 }
0x1b2b   :  { %3286 = vmatpush3.msra.mxu1 %v2697_v11 }
0x1b2c   :  { %3290 = vmatprep.subr.mxu1 %v3403_v2 }
0x1be4   :  { %v2664_v58 = vpop.f32.mrf.mxu1 }
0x1be5   :  { %v2670_v3 = vsel %vm195_vm2, %v2664_v58, 0.0 }
0x1be6   :  { %2671 = vadd.xlane.f32.xlu0 %v2670_v3  ;;  %v3278_v61 = vpop.f32.mrf.mxu1 }
0x1c6f   :  { %v2672_v8 = vpop.xlane.xlu0 %2671 }
0x1c70   :  { %v2673_v0 = vmul.f32 0.03125, %v2672_v8 }
0x1c72   :  { %v2674_v60 = vsub.f32 %v2664_v58, %v2673_v0 }
0x1c74   :  { %v2675_v9 = vmul.f32 %v2674_v60, %v2674_v60 }
0x1c76   :  { %v2676_v4 = vsel %vm195_vm2, %v2675_v9, 0.0 }
0x1c77   :  { %2677 = vadd.xlane.f32.xlu1 %v2676_v4 }
0x1c88   :  { %2863 = vperm.xlu1 %3307, %v2988_v27  }
0x1d00   :  { %v2678_v12 = vpop.xlane.xlu1 %2677 }
0x1d01   :  { %v2679_v13 = vmul.f32 0.03125, %v2678_v12 }
0x1d03   :  { %v2680_v14 = vadd.f32 1e-05, %v2679_v13 }
0x1d04   :  { %v2864_v32 = vpop.permute.xlu1 %2863 }
0x1d05   :  { %3377 = vrsqrt.f32 %v2680_v14 }
0x1d12   :  { %v3378_v15 = vpop.eup %3377 }
0x1d13   :  { %v2682_v17 = vmul.f32 %v3378_v15, %v2674_v60 }
0x1d15   :  { %v2689_v19 = vmul.f32 %v2984_v16, %v2682_v17 }
0x1d17   :  { %v2696_v20 = vadd.f32 %v2985_v18, %v2689_v19 }
0x1d19   :  { %3288 = vmatmul.mubr.msk.f32.vlgmr.msra.gmra.mxu1 %vm191_vm1, %v2696_v20 }
0x1d1a   :  { %3294 = vmatprep.mubr.msk.f32.mxu1 %vm3404_vm3, %v3403_v2  ;;  %3291 = vmatpush3.msra.mxu1 %v2783_v25 }
0x1d1b   :  { %3292 = vmatprep.subr.mxu1 %v3403_v2 }
0x1d1c   :  { %3293 = vmatpush3.msra.mxu1 %v2782_v26 }
0x1dd9   :  { %v2770_v21 = vpop.f32.mrf.mxu1 }
0x1dda   :  { %v2774_v22 = vmul.f32 %v2770_v21, %v2770_v21 }
0x1ddb   :  { %v3289_v23 = vpop.f32.mrf.mxu1 }
0x1ddc   :  { %v2776_v24 = vsel %vm2775_vm13, %v2774_v22, 0.0 }
0x1ddd   :  { %2777 = vadd.xlane.f32.xlu0 %v2776_v24 }
0x1e66   :  { %v2778_v29 = vpop.xlane.xlu0 %2777 }
0x1e67   :  { %3379 = vrsqrt.f32 %v2778_v29 }
0x1e74   :  { %v3380_v30 = vpop.eup %3379 }
0x1e75   :  { %v2780_v31 = vmul.f32 %v3380_v30, %v2770_v21 }
0x1e77   :  { %3295 = vmatmul.mubr.msk.f32.vlgmr.msra.gmra.mxu1 %vm375_vm4, %v2780_v31 }
0x1f37   :  { %v2853_v33 = vpop.f32.mrf.mxu1 }
0x1f38   :  { %v2866_v34 = vmul.f32 %v2864_v32, %v2853_v33 }
0x1f39   :  { %v3296_v35 = vpop.f32.mrf.mxu1 }
0x1f3a   :  { %2867 = vst [vmem:[#allocation4] sm:$0x3] %v2866_v34 }
0x1f3b   :  { %3392 = shalt.err (!%p3389_p4)
}
0x1f3c   :  { %2877 = dma.vmem_to_hbm [thread:$0]  %s2875_s10, 32, %s4140_s23, [#allocation5]  }
0x1f3d   :  { %3401 = dma.done.wait [#allocation5], 32  }
0x1f3e   :  { %3402 = vsyncadd [#allocation5], 4294967264 }
0x1f3f   :  { %2881 = vsyncpa [#allocation5], 1 }

</bundles_post_ra>
